<compile_context>
chip_gen: v6e
topology: v6e:2x2x1
jax: 0.10.0
libtpu: 0.0.40
codegen_flags: <defaults>
</compile_context>

<pallas_src>
import functools
import math

import jax
import jax.numpy as jnp
from jax.experimental import pallas as pl
from jax.experimental.pallas import tpu as pltpu

F32 = jnp.float32
BF16 = jnp.bfloat16


def _relu(t):
    return jnp.maximum(t, 0.0)


def _round_up(x, m):
    return ((x + m - 1) // m) * m


def _pad2(a, rows, cols):
    return jnp.pad(a, ((0, rows - a.shape[0]), (0, cols - a.shape[1])))


# ---------------------------------------------------------------------------
# Kernel 1: per-node MLPs.   h = mlp_pre(x),  m = relu(lin(h))
# ---------------------------------------------------------------------------
def node_kernel(x_ref, w1_ref, b1_ref, w2_ref, b2_ref, w3_ref, b3_ref,
                wl_ref, bl_ref, h_ref, m_ref):
    xb = x_ref[...].astype(BF16)
    h = _relu(jnp.dot(xb, w1_ref[...], preferred_element_type=F32) + b1_ref[...])
    hb = h.astype(BF16)
    h = _relu(jnp.dot(hb, w2_ref[...], preferred_element_type=F32) + b2_ref[...])
    hb = h.astype(BF16)
    h = _relu(jnp.dot(hb, w3_ref[...], preferred_element_type=F32) + b3_ref[...])
    hb = h.astype(BF16)
    m = _relu(jnp.dot(hb, wl_ref[...], preferred_element_type=F32) + bl_ref[...])
    h_ref[...] = hb                # bf16: matmul input of mlp_post
    m_ref[...] = m.astype(BF16)    # bf16: matmul input of A @ m


# ---------------------------------------------------------------------------
# Kernel 2: 'add' aggregation as dense A @ m (f32 VMEM accumulator over src
# tiles) + mlp_post + outer ReLU, finalized once per dst tile.
# ---------------------------------------------------------------------------
def agg_post_kernel(adj_ref, h_ref, m_ref,
                    wp1a_ref, wp1b_ref, bp1_ref,
                    wp2_ref, bp2_ref, wp3_ref, bp3_ref,
                    out_ref, acc_ref):
    k = pl.program_id(1)

    @pl.when(k == 0)
    def _():
        acc_ref[...] = jnp.zeros_like(acc_ref)

    acc_ref[...] += jnp.dot(adj_ref[...], m_ref[...],
                            preferred_element_type=F32)

    @pl.when(k == pl.num_programs(1) - 1)
    def _():
        agg = acc_ref[...].astype(BF16)
        h = h_ref[...]
        # concat-matmul split: [h, agg] @ Wp1 == h @ Wp1[:H] + agg @ Wp1[H:]
        z = _relu(jnp.dot(h, wp1a_ref[...], preferred_element_type=F32)
                  + jnp.dot(agg, wp1b_ref[...], preferred_element_type=F32)
                  + bp1_ref[...])
        z = _relu(jnp.dot(z.astype(BF16), wp2_ref[...],
                          preferred_element_type=F32) + bp2_ref[...])
        out = jnp.dot(z.astype(BF16), wp3_ref[...],
                      preferred_element_type=F32) + bp3_ref[...]
        out_ref[...] = _relu(out)          # GNNCASimple outer activation


# ---------------------------------------------------------------------------
# Parameters
# ---------------------------------------------------------------------------
def init_params(key, dim_size, hidden):
    """Raw (unpadded) Linear params: W [in, out], b [1, out]."""
    def linear(k, fan_in, fan_out):
        kw, kb = jax.random.split(k)
        bound = 1.0 / math.sqrt(fan_in)
        w = jax.random.uniform(kw, (fan_in, fan_out), F32, -bound, bound)
        b = jax.random.uniform(kb, (1, fan_out), F32, -bound, bound)
        return w, b

    keys = jax.random.split(key, 7)
    w1, b1 = linear(keys[0], dim_size, hidden)        # mlp_pre[0]
    w2, b2 = linear(keys[1], hidden, hidden)          # mlp_pre[2]
    w3, b3 = linear(keys[2], hidden, hidden)          # mlp_pre[4]
    wl, bl = linear(keys[3], hidden, hidden)          # lin
    wp1, bp1 = linear(keys[4], 2 * hidden, hidden)    # mlp_post[0]
    wp2, bp2 = linear(keys[5], hidden, hidden)        # mlp_post[2]
    wp3, bp3 = linear(keys[6], hidden, dim_size)      # mlp_post[4]
    return dict(w1=w1, b1=b1, w2=w2, b2=b2, w3=w3, b3=b3, wl=wl, bl=bl,
                wp1=wp1, bp1=bp1, wp2=wp2, bp2=bp2, wp3=wp3, bp3=bp3)


def _prepare_params(params, hidden, dp, hp):
    """Pad to lane-dense shapes (multiples of 128), split Wp1 for the
    concat-matmul, cast weights to bf16 (MXU inputs); biases stay f32."""
    wp1a = params["wp1"][:hidden]          # multiplies h
    wp1b = params["wp1"][hidden:]          # multiplies agg
    wb = lambda w, r, c: _pad2(w, r, c).astype(BF16)
    fb = lambda b, c: _pad2(b, 1, c)
    return dict(
        w1=wb(params["w1"], dp, hp), b1=fb(params["b1"], hp),
        w2=wb(params["w2"], hp, hp), b2=fb(params["b2"], hp),
        w3=wb(params["w3"], hp, hp), b3=fb(params["b3"], hp),
        wl=wb(params["wl"], hp, hp), bl=fb(params["bl"], hp),
        wp1a=wb(wp1a, hp, hp), wp1b=wb(wp1b, hp, hp), bp1=fb(params["bp1"], hp),
        wp2=wb(params["wp2"], hp, hp), bp2=fb(params["bp2"], hp),
        wp3=wb(params["wp3"], hp, dp), bp3=fb(params["bp3"], dp),
    )


# ---------------------------------------------------------------------------
# Forward wrapper
# ---------------------------------------------------------------------------
@functools.partial(jax.jit, static_argnames=("iterations", "node_tile"))
def gnnca_forward(x, adj, params, *, iterations=1, node_tile=128):
    """x: [N, dim_size] f32; adj: [N, N] f32 with adj[dst, src] = #edges."""
    n, d = x.shape
    hidden = params["w2"].shape[0]
    dp = _round_up(d, 128)          # lane-dense feature dim
    hp = _round_up(hidden, 128)     # lane-dense hidden dim
    tn = node_tile                  # node tile (sublane/M dim and adj src tile)
    np_ = _round_up(n, tn)
    n_tiles = np_ // tn

    pp = _prepare_params(params, hidden, dp, hp)
    xp = _pad2(x.astype(F32), np_, dp)
    adjp = _pad2(adj, np_, np_).astype(BF16)   # edge counts <= 256 exact in bf16

    vmem_limit = 32 * 1024 * 1024

    # ---- kernel 1: node MLPs, grid over node tiles (parallel) --------------
    wspec1 = lambda shape: pl.BlockSpec(shape, lambda i: (0, 0))
    node_call = pl.pallas_call(
        node_kernel,
        out_shape=(jax.ShapeDtypeStruct((np_, hp), BF16),
                   jax.ShapeDtypeStruct((np_, hp), BF16)),
        grid_spec=pltpu.PrefetchScalarGridSpec(
            num_scalar_prefetch=0,
            grid=(n_tiles,),
            in_specs=[pl.BlockSpec((tn, dp), lambda i: (i, 0)),   # x tile
                      wspec1((dp, hp)), wspec1((1, hp)),          # w1, b1
                      wspec1((hp, hp)), wspec1((1, hp)),          # w2, b2
                      wspec1((hp, hp)), wspec1((1, hp)),          # w3, b3
                      wspec1((hp, hp)), wspec1((1, hp))],         # wl, bl
            out_specs=[pl.BlockSpec((tn, hp), lambda i: (i, 0)),  # h
                       pl.BlockSpec((tn, hp), lambda i: (i, 0))]),  # m
        compiler_params=pltpu.CompilerParams(
            dimension_semantics=("parallel",),
            vmem_limit_bytes=vmem_limit),
        cost_estimate=pl.CostEstimate(
            flops=2 * np_ * hp * (dp + 3 * hp),
            transcendentals=0,
            bytes_accessed=(np_ * dp * 4 + (dp * hp + 3 * hp * hp) * 2
                            + 4 * hp * 4 + 2 * np_ * hp * 2)),
    )

    # ---- kernel 2: aggregation + mlp_post, grid (dst_tile, src_tile) --------
    wspec2 = lambda shape: pl.BlockSpec(shape, lambda i, k: (0, 0))
    agg_call = pl.pallas_call(
        agg_post_kernel,
        out_shape=jax.ShapeDtypeStruct((np_, dp), F32),
        grid_spec=pltpu.PrefetchScalarGridSpec(
            num_scalar_prefetch=0,
            grid=(n_tiles, n_tiles),
            in_specs=[pl.BlockSpec((tn, tn), lambda i, k: (i, k)),   # adj tile
                      pl.BlockSpec((tn, hp), lambda i, k: (i, 0)),   # h (dst)
                      pl.BlockSpec((tn, hp), lambda i, k: (k, 0)),   # m (src)
                      wspec2((hp, hp)), wspec2((hp, hp)), wspec2((1, hp)),  # wp1a, wp1b, bp1
                      wspec2((hp, hp)), wspec2((1, hp)),                    # wp2, bp2
                      wspec2((hp, dp)), wspec2((1, dp))],                   # wp3, bp3
            out_specs=pl.BlockSpec((tn, dp), lambda i, k: (i, 0)),
            scratch_shapes=[pltpu.VMEM((tn, hp), F32)]),             # agg accumulator
        compiler_params=pltpu.CompilerParams(
            dimension_semantics=("parallel", "arbitrary"),
            vmem_limit_bytes=vmem_limit),
        cost_estimate=pl.CostEstimate(
            flops=2 * np_ * np_ * hp + 2 * np_ * (3 * hp * hp + hp * dp),
            transcendentals=0,
            bytes_accessed=(np_ * np_ * 2 + 2 * np_ * hp * 2
                            + (3 * hp * hp + hp * dp) * 2
                            + (3 * hp + dp) * 4 + np_ * dp * 4)),
    )

    node_args = ("w1", "b1", "w2", "b2", "w3", "b3", "wl", "bl")
    post_args = ("wp1a", "wp1b", "bp1", "wp2", "bp2", "wp3", "bp3")

    # TODO(synk): when the whole padded state + adjacency fits VMEM, the CA
    # iterations could be fused into a single kernel (lax.fori_loop over a
    # VMEM-resident x) to remove per-iteration launch/DMA overhead; kept at the
    # JAX level so the tiled, N-scalable path remains the single code path.
    for _ in range(iterations):
        h, m = node_call(xp, *(pp[k] for k in node_args))
        xp = agg_call(adjp, h, m, *(pp[k] for k in post_args))

    # TODO(synk): hardmax (one_hot(argmax)) and batch_norm paths not implemented;
    # module defaults are hardmax=False, batch_norm=False.
    return xp[:n, :d]


# ---------------------------------------------------------------------------
# Pure-JAX references
# ---------------------------------------------------------------------------
def gnnca_reference_f32(x, adj, params, iterations=1):
    """Exact f32 mirror of the PyTorch module's math."""
    for _ in range(iterations):
        h = _relu(x @ params["w1"] + params["b1"])
        h = _relu(h @ params["w2"] + params["b2"])
        h = _relu(h @ params["w3"] + params["b3"])
        m = _relu(h @ params["wl"] + params["bl"])
        agg = adj @ m
        z = _relu(jnp.concatenate([h, agg], axis=1) @ params["wp1"] + params["bp1"])
        z = _relu(z @ params["wp2"] + params["bp2"])
        x = _relu(z @ params["wp3"] + params["bp3"])
    return x


def gnnca_reference_bf16(x, adj, params, iterations=1):
    """Mirror of the kernel's bf16-input / f32-accumulation numerics."""
    hidden = params["w2"].shape[0]
    dot = lambda a, b: jnp.dot(a.astype(BF16), b.astype(BF16),
                               preferred_element_type=F32)
    for _ in range(iterations):
        h = _relu(dot(x, params["w1"]) + params["b1"])
        h = _relu(dot(h, params["w2"]) + params["b2"])
        h = _relu(dot(h, params["w3"]) + params["b3"])
        m = _relu(dot(h, params["wl"]) + params["bl"]).astype(BF16)
        agg = jnp.dot(adj.astype(BF16), m, preferred_element_type=F32)
        z = _relu(dot(h, params["wp1"][:hidden])
                  + dot(agg, params["wp1"][hidden:]) + params["bp1"])
        z = _relu(dot(z, params["wp2"]) + params["bp2"])
        x = _relu(dot(z, params["wp3"]) + params["bp3"])
    return x


if __name__ == "__main__":
    key = jax.random.PRNGKey(0)
    k_x, k_e, k_p, k_x2, k_e2 = jax.random.split(key, 5)

    DIM = 4        # dim_size (node feature channels)
    HIDDEN = 32    # hidden width of the GNN MLPs

    params = init_params(k_p, DIM, HIDDEN)

    # --- test 1: tiny graph, 2 CA iterations (single tile after padding) ----
    N1, E1 = 16, 32
    x1 = jax.random.normal(k_x, (N1, DIM), dtype=F32)
    ei1 = jax.random.randint(k_e, (2, E1), 0, N1)      # row 0 = src, row 1 = dst
    adj1 = jnp.zeros((N1, N1), F32).at[ei1[1], ei1[0]].add(1.0)

    out1 = jax.block_until_ready(gnnca_forward(x1, adj1, params, iterations=2))
    ref1_bf16 = gnnca_reference_bf16(x1, adj1, params, iterations=2)
    ref1_f32 = gnnca_reference_f32(x1, adj1, params, iterations=2)
    assert out1.shape == (N1, DIM)
    assert jnp.allclose(out1, ref1_bf16, atol=5e-3, rtol=5e-3)
    assert jnp.allclose(out1, ref1_f32, atol=1e-1, rtol=1e-1)

    # --- test 2: larger graph exercising the multi-tile (dst, src) grid -----
    N2, E2 = 300, 1200
    x2 = jax.random.normal(k_x2, (N2, DIM), dtype=F32)
    ei2 = jax.random.randint(k_e2, (2, E2), 0, N2)
    adj2 = jnp.zeros((N2, N2), F32).at[ei2[1], ei2[0]].add(1.0)

    out2 = jax.block_until_ready(gnnca_forward(x2, adj2, params, iterations=1))
    ref2_bf16 = gnnca_reference_bf16(x2, adj2, params, iterations=1)
    assert out2.shape == (N2, DIM)
    assert jnp.allclose(out2, ref2_bf16, atol=5e-3, rtol=5e-3)

    print("KERNEL_OK")
</pallas_src>

<mosaic_0001>
module attributes {stable_mosaic.version = 11 : i64} {
  func.func @agg_post_kernel(%arg0: i32, %arg1: i32, %arg2: memref<128x128xbf16, #tpu.memory_space<vmem>>, %arg3: memref<128x128xbf16, #tpu.memory_space<vmem>>, %arg4: memref<128x128xbf16, #tpu.memory_space<vmem>>, %arg5: memref<128x128xbf16, #tpu.memory_space<vmem>>, %arg6: memref<128x128xbf16, #tpu.memory_space<vmem>>, %arg7: memref<1x128xf32, #tpu.memory_space<vmem>>, %arg8: memref<128x128xbf16, #tpu.memory_space<vmem>>, %arg9: memref<1x128xf32, #tpu.memory_space<vmem>>, %arg10: memref<128x128xbf16, #tpu.memory_space<vmem>>, %arg11: memref<1x128xf32, #tpu.memory_space<vmem>>, %arg12: memref<128x128xf32, #tpu.memory_space<vmem>>, %arg13: memref<128x128xf32, #tpu.memory_space<vmem>>) attributes {dimension_semantics = [#tpu.dimension_semantics<parallel>, #tpu.dimension_semantics<arbitrary>], iteration_bounds = array<i64: 1, 1>, scalar_prefetch = 0 : i64, scratch_operands = 1 : i64, tpu.core_type = #tpu.core_type<tc>, window_params = [{transform_indices = @transform_0, window_bounds = array<i64: 128, 128>}, {transform_indices = @transform_1, window_bounds = array<i64: 128, 128>}, {transform_indices = @transform_2, window_bounds = array<i64: 128, 128>}, {pipeline_mode = #tpu.pipeline_mode<synchronous>, transform_indices = @transform_3, window_bounds = array<i64: 128, 128>}, {pipeline_mode = #tpu.pipeline_mode<synchronous>, transform_indices = @transform_4, window_bounds = array<i64: 128, 128>}, {pipeline_mode = #tpu.pipeline_mode<synchronous>, transform_indices = @transform_5, window_bounds = array<i64: 1, 128>}, {pipeline_mode = #tpu.pipeline_mode<synchronous>, transform_indices = @transform_6, window_bounds = array<i64: 128, 128>}, {pipeline_mode = #tpu.pipeline_mode<synchronous>, transform_indices = @transform_7, window_bounds = array<i64: 1, 128>}, {pipeline_mode = #tpu.pipeline_mode<synchronous>, transform_indices = @transform_8, window_bounds = array<i64: 128, 128>}, {pipeline_mode = #tpu.pipeline_mode<synchronous>, transform_indices = @transform_9, window_bounds = array<i64: 1, 128>}, {transform_indices = @transform_10, window_bounds = array<i64: 128, 128>}]} {
    %c0_i32 = arith.constant 0 : i32
    %0 = arith.cmpi eq, %arg1, %c0_i32 : i32
    %1 = arith.extui %0 : i1 to i32
    %c0_i32_0 = arith.constant 0 : i32
    %2 = arith.cmpi ne, %1, %c0_i32_0 : i32
    scf.if %2 {
      %cst_10 = arith.constant 0.000000e+00 : f32
      %12 = vector.broadcast %cst_10 : f32 to vector<128x128xf32>
      %c0_11 = arith.constant 0 : index
      %c0_12 = arith.constant 0 : index
      %13 = vector.load %arg13[%c0_11, %c0_12] : memref<128x128xf32, #tpu.memory_space<vmem>>, vector<128x128xf32>
      tpu.vector_store %arg13[%c0_11, %c0_12], %12 {strides = array<i32>} : memref<128x128xf32, #tpu.memory_space<vmem>>, vector<128x128xf32>,
    } else {
    }
    %c0 = arith.constant 0 : index
    %c0_1 = arith.constant 0 : index
    %3 = vector.load %arg13[%c0, %c0_1] : memref<128x128xf32, #tpu.memory_space<vmem>>, vector<128x128xf32>
    %c0_2 = arith.constant 0 : index
    %c0_3 = arith.constant 0 : index
    %4 = vector.load %arg2[%c0_2, %c0_3] : memref<128x128xbf16, #tpu.memory_space<vmem>>, vector<128x128xbf16>
    %c0_4 = arith.constant 0 : index
    %c0_5 = arith.constant 0 : index
    %5 = vector.load %arg4[%c0_4, %c0_5] : memref<128x128xbf16, #tpu.memory_space<vmem>>, vector<128x128xbf16>
    %cst = arith.constant dense<0.000000e+00> : vector<128x128xf32>
    %6 = tpu.matmul %4, %5, %cst {dimension_numbers = #tpu.dot_dimension_numbers<[1], [0], [0], [1], [0, 0, 1, 1], [], []>} : vector<128x128xbf16>, vector<128x128xbf16>, vector<128x128xf32> -> vector<128x128xf32>
    %7 = arith.addf %3, %6 : vector<128x128xf32>
    %c0_6 = arith.constant 0 : index
    %c0_7 = arith.constant 0 : index
    %8 = vector.load %arg13[%c0_6, %c0_7] : memref<128x128xf32, #tpu.memory_space<vmem>>, vector<128x128xf32>
    tpu.vector_store %arg13[%c0_6, %c0_7], %7 {strides = array<i32>} : memref<128x128xf32, #tpu.memory_space<vmem>>, vector<128x128xf32>,
    %c0_i32_8 = arith.constant 0 : i32
    %9 = arith.cmpi eq, %arg1, %c0_i32_8 : i32
    %10 = arith.extui %9 : i1 to i32
    %c0_i32_9 = arith.constant 0 : i32
    %11 = arith.cmpi ne, %10, %c0_i32_9 : i32
    scf.if %11 {
      %c0_10 = arith.constant 0 : index
      %c0_11 = arith.constant 0 : index
      %12 = vector.load %arg13[%c0_10, %c0_11] : memref<128x128xf32, #tpu.memory_space<vmem>>, vector<128x128xf32>
      %13 = arith.truncf %12 : vector<128x128xf32> to vector<128x128xbf16>
      %c0_12 = arith.constant 0 : index
      %c0_13 = arith.constant 0 : index
      %14 = vector.load %arg3[%c0_12, %c0_13] : memref<128x128xbf16, #tpu.memory_space<vmem>>, vector<128x128xbf16>
      %c0_14 = arith.constant 0 : index
      %c0_15 = arith.constant 0 : index
      %15 = vector.load %arg5[%c0_14, %c0_15] : memref<128x128xbf16, #tpu.memory_space<vmem>>, vector<128x128xbf16>
      %cst_16 = arith.constant dense<0.000000e+00> : vector<128x128xf32>
      %16 = tpu.matmul %14, %15, %cst_16 {dimension_numbers = #tpu.dot_dimension_numbers<[1], [0], [0], [1], [0, 0, 1, 1], [], []>} : vector<128x128xbf16>, vector<128x128xbf16>, vector<128x128xf32> -> vector<128x128xf32>
      %c0_17 = arith.constant 0 : index
      %c0_18 = arith.constant 0 : index
      %17 = vector.load %arg6[%c0_17, %c0_18] : memref<128x128xbf16, #tpu.memory_space<vmem>>, vector<128x128xbf16>
      %cst_19 = arith.constant dense<0.000000e+00> : vector<128x128xf32>
      %18 = tpu.matmul %13, %17, %cst_19 {dimension_numbers = #tpu.dot_dimension_numbers<[1], [0], [0], [1], [0, 0, 1, 1], [], []>} : vector<128x128xbf16>, vector<128x128xbf16>, vector<128x128xf32> -> vector<128x128xf32>
      %19 = arith.addf %16, %18 : vector<128x128xf32>
      %c0_20 = arith.constant 0 : index
      %c0_21 = arith.constant 0 : index
      %20 = vector.load %arg7[%c0_20, %c0_21] : memref<1x128xf32, #tpu.memory_space<vmem>>, vector<1x128xf32>
      %21 = vector.broadcast %20 : vector<1x128xf32> to vector<128x128xf32>
      %22 = arith.addf %19, %21 : vector<128x128xf32>
      %cst_22 = arith.constant 0.000000e+00 : f32
      %23 = vector.broadcast %cst_22 : f32 to vector<128x128xf32>
      %24 = arith.maximumf %22, %23 : vector<128x128xf32>
      %25 = arith.truncf %24 : vector<128x128xf32> to vector<128x128xbf16>
      %c0_23 = arith.constant 0 : index
      %c0_24 = arith.constant 0 : index
      %26 = vector.load %arg8[%c0_23, %c0_24] : memref<128x128xbf16, #tpu.memory_space<vmem>>, vector<128x128xbf16>
      %cst_25 = arith.constant dense<0.000000e+00> : vector<128x128xf32>
      %27 = tpu.matmul %25, %26, %cst_25 {dimension_numbers = #tpu.dot_dimension_numbers<[1], [0], [0], [1], [0, 0, 1, 1], [], []>} : vector<128x128xbf16>, vector<128x128xbf16>, vector<128x128xf32> -> vector<128x128xf32>
      %c0_26 = arith.constant 0 : index
      %c0_27 = arith.constant 0 : index
      %28 = vector.load %arg9[%c0_26, %c0_27] : memref<1x128xf32, #tpu.memory_space<vmem>>, vector<1x128xf32>
      %29 = vector.broadcast %28 : vector<1x128xf32> to vector<128x128xf32>
      %30 = arith.addf %27, %29 : vector<128x128xf32>
      %cst_28 = arith.constant 0.000000e+00 : f32
      %31 = vector.broadcast %cst_28 : f32 to vector<128x128xf32>
      %32 = arith.maximumf %30, %31 : vector<128x128xf32>
      %33 = arith.truncf %32 : vector<128x128xf32> to vector<128x128xbf16>
      %c0_29 = arith.constant 0 : index
      %c0_30 = arith.constant 0 : index
      %34 = vector.load %arg10[%c0_29, %c0_30] : memref<128x128xbf16, #tpu.memory_space<vmem>>, vector<128x128xbf16>
      %cst_31 = arith.constant dense<0.000000e+00> : vector<128x128xf32>
      %35 = tpu.matmul %33, %34, %cst_31 {dimension_numbers = #tpu.dot_dimension_numbers<[1], [0], [0], [1], [0, 0, 1, 1], [], []>} : vector<128x128xbf16>, vector<128x128xbf16>, vector<128x128xf32> -> vector<128x128xf32>
      %c0_32 = arith.constant 0 : index
      %c0_33 = arith.constant 0 : index
      %36 = vector.load %arg11[%c0_32, %c0_33] : memref<1x128xf32, #tpu.memory_space<vmem>>, vector<1x128xf32>
      %37 = vector.broadcast %36 : vector<1x128xf32> to vector<128x128xf32>
      %38 = arith.addf %35, %37 : vector<128x128xf32>
      %cst_34 = arith.constant 0.000000e+00 : f32
      %39 = vector.broadcast %cst_34 : f32 to vector<128x128xf32>
      %40 = arith.maximumf %38, %39 : vector<128x128xf32>
      %c0_35 = arith.constant 0 : index
      %c0_36 = arith.constant 0 : index
      %41 = vector.load %arg12[%c0_35, %c0_36] : memref<128x128xf32, #tpu.memory_space<vmem>>, vector<128x128xf32>
      tpu.vector_store %arg12[%c0_35, %c0_36], %40 {strides = array<i32>} : memref<128x128xf32, #tpu.memory_space<vmem>>, vector<128x128xf32>,
    } else {
    }
    return
  }
  func.func @transform_0(%arg0: i32, %arg1: i32) -> (i32, i32) {
    %c0_i32 = arith.constant 0 : i32
    return %arg0, %arg1 : i32, i32
  }
  func.func @transform_1(%arg0: i32, %arg1: i32) -> (i32, i32) {
    %c0_i32 = arith.constant 0 : i32
    %c0_i32_0 = arith.constant 0 : i32
    return %arg0, %c0_i32 : i32, i32
  }
  func.func @transform_2(%arg0: i32, %arg1: i32) -> (i32, i32) {
    %c0_i32 = arith.constant 0 : i32
    %c0_i32_0 = arith.constant 0 : i32
    return %arg1, %c0_i32 : i32, i32
  }
  func.func @transform_3(%arg0: i32, %arg1: i32) -> (i32, i32) {
    %c0_i32 = arith.constant 0 : i32
    %c0_i32_0 = arith.constant 0 : i32
    %c0_i32_1 = arith.constant 0 : i32
    return %c0_i32, %c0_i32_0 : i32, i32
  }
  func.func @transform_4(%arg0: i32, %arg1: i32) -> (i32, i32) {
    %c0_i32 = arith.constant 0 : i32
    %c0_i32_0 = arith.constant 0 : i32
    %c0_i32_1 = arith.constant 0 : i32
    return %c0_i32, %c0_i32_0 : i32, i32
  }
  func.func @transform_5(%arg0: i32, %arg1: i32) -> (i32, i32) {
    %c0_i32 = arith.constant 0 : i32
    %c0_i32_0 = arith.constant 0 : i32
    %c0_i32_1 = arith.constant 0 : i32
    return %c0_i32, %c0_i32_0 : i32, i32
  }
  func.func @transform_6(%arg0: i32, %arg1: i32) -> (i32, i32) {
    %c0_i32 = arith.constant 0 : i32
    %c0_i32_0 = arith.constant 0 : i32
    %c0_i32_1 = arith.constant 0 : i32
    return %c0_i32, %c0_i32_0 : i32, i32
  }
  func.func @transform_7(%arg0: i32, %arg1: i32) -> (i32, i32) {
    %c0_i32 = arith.constant 0 : i32
    %c0_i32_0 = arith.constant 0 : i32
    %c0_i32_1 = arith.constant 0 : i32
    return %c0_i32, %c0_i32_0 : i32, i32
  }
  func.func @transform_8(%arg0: i32, %arg1: i32) -> (i32, i32) {
    %c0_i32 = arith.constant 0 : i32
    %c0_i32_0 = arith.constant 0 : i32
    %c0_i32_1 = arith.constant 0 : i32
    return %c0_i32, %c0_i32_0 : i32, i32
  }
  func.func @transform_9(%arg0: i32, %arg1: i32) -> (i32, i32) {
    %c0_i32 = arith.constant 0 : i32
    %c0_i32_0 = arith.constant 0 : i32
    %c0_i32_1 = arith.constant 0 : i32
    return %c0_i32, %c0_i32_0 : i32, i32
  }
  func.func @transform_10(%arg0: i32, %arg1: i32) -> (i32, i32) {
    %c0_i32 = arith.constant 0 : i32
    %c0_i32_0 = arith.constant 0 : i32
    return %arg0, %c0_i32 : i32, i32
  }
}

module attributes {stable_mosaic.version = 11 : i64} {
  func.func @node_kernel(%arg0: i32, %arg1: memref<128x128xf32, #tpu.memory_space<vmem>>, %arg2: memref<128x128xbf16, #tpu.memory_space<vmem>>, %arg3: memref<1x128xf32, #tpu.memory_space<vmem>>, %arg4: memref<128x128xbf16, #tpu.memory_space<vmem>>, %arg5: memref<1x128xf32, #tpu.memory_space<vmem>>, %arg6: memref<128x128xbf16, #tpu.memory_space<vmem>>, %arg7: memref<1x128xf32, #tpu.memory_space<vmem>>, %arg8: memref<128x128xbf16, #tpu.memory_space<vmem>>, %arg9: memref<1x128xf32, #tpu.memory_space<vmem>>, %arg10: memref<128x128xbf16, #tpu.memory_space<vmem>>, %arg11: memref<128x128xbf16, #tpu.memory_space<vmem>>) attributes {dimension_semantics = [#tpu.dimension_semantics<parallel>], iteration_bounds = array<i64: 1>, scalar_prefetch = 0 : i64, scratch_operands = 0 : i64, tpu.core_type = #tpu.core_type<tc>, window_params = [{transform_indices = @transform_0, window_bounds = array<i64: 128, 128>}, {pipeline_mode = #tpu.pipeline_mode<synchronous>, transform_indices = @transform_1, window_bounds = array<i64: 128, 128>}, {pipeline_mode = #tpu.pipeline_mode<synchronous>, transform_indices = @transform_2, window_bounds = array<i64: 1, 128>}, {pipeline_mode = #tpu.pipeline_mode<synchronous>, transform_indices = @transform_3, window_bounds = array<i64: 128, 128>}, {pipeline_mode = #tpu.pipeline_mode<synchronous>, transform_indices = @transform_4, window_bounds = array<i64: 1, 128>}, {pipeline_mode = #tpu.pipeline_mode<synchronous>, transform_indices = @transform_5, window_bounds = array<i64: 128, 128>}, {pipeline_mode = #tpu.pipeline_mode<synchronous>, transform_indices = @transform_6, window_bounds = array<i64: 1, 128>}, {pipeline_mode = #tpu.pipeline_mode<synchronous>, transform_indices = @transform_7, window_bounds = array<i64: 128, 128>}, {pipeline_mode = #tpu.pipeline_mode<synchronous>, transform_indices = @transform_8, window_bounds = array<i64: 1, 128>}, {transform_indices = @transform_9, window_bounds = array<i64: 128, 128>}, {transform_indices = @transform_10, window_bounds = array<i64: 128, 128>}]} {
    %c0 = arith.constant 0 : index
    %c0_0 = arith.constant 0 : index
    %0 = vector.load %arg1[%c0, %c0_0] : memref<128x128xf32, #tpu.memory_space<vmem>>, vector<128x128xf32>
    %1 = arith.truncf %0 : vector<128x128xf32> to vector<128x128xbf16>
    %c0_1 = arith.constant 0 : index
    %c0_2 = arith.constant 0 : index
    %2 = vector.load %arg2[%c0_1, %c0_2] : memref<128x128xbf16, #tpu.memory_space<vmem>>, vector<128x128xbf16>
    %cst = arith.constant dense<0.000000e+00> : vector<128x128xf32>
    %3 = tpu.matmul %1, %2, %cst {dimension_numbers = #tpu.dot_dimension_numbers<[1], [0], [0], [1], [0, 0, 1, 1], [], []>} : vector<128x128xbf16>, vector<128x128xbf16>, vector<128x128xf32> -> vector<128x128xf32>
    %c0_3 = arith.constant 0 : index
    %c0_4 = arith.constant 0 : index
    %4 = vector.load %arg3[%c0_3, %c0_4] : memref<1x128xf32, #tpu.memory_space<vmem>>, vector<1x128xf32>
    %5 = vector.broadcast %4 : vector<1x128xf32> to vector<128x128xf32>
    %6 = arith.addf %3, %5 : vector<128x128xf32>
    %cst_5 = arith.constant 0.000000e+00 : f32
    %7 = vector.broadcast %cst_5 : f32 to vector<128x128xf32>
    %8 = arith.maximumf %6, %7 : vector<128x128xf32>
    %9 = arith.truncf %8 : vector<128x128xf32> to vector<128x128xbf16>
    %c0_6 = arith.constant 0 : index
    %c0_7 = arith.constant 0 : index
    %10 = vector.load %arg4[%c0_6, %c0_7] : memref<128x128xbf16, #tpu.memory_space<vmem>>, vector<128x128xbf16>
    %cst_8 = arith.constant dense<0.000000e+00> : vector<128x128xf32>
    %11 = tpu.matmul %9, %10, %cst_8 {dimension_numbers = #tpu.dot_dimension_numbers<[1], [0], [0], [1], [0, 0, 1, 1], [], []>} : vector<128x128xbf16>, vector<128x128xbf16>, vector<128x128xf32> -> vector<128x128xf32>
    %c0_9 = arith.constant 0 : index
    %c0_10 = arith.constant 0 : index
    %12 = vector.load %arg5[%c0_9, %c0_10] : memref<1x128xf32, #tpu.memory_space<vmem>>, vector<1x128xf32>
    %13 = vector.broadcast %12 : vector<1x128xf32> to vector<128x128xf32>
    %14 = arith.addf %11, %13 : vector<128x128xf32>
    %cst_11 = arith.constant 0.000000e+00 : f32
    %15 = vector.broadcast %cst_11 : f32 to vector<128x128xf32>
    %16 = arith.maximumf %14, %15 : vector<128x128xf32>
    %17 = arith.truncf %16 : vector<128x128xf32> to vector<128x128xbf16>
    %c0_12 = arith.constant 0 : index
    %c0_13 = arith.constant 0 : index
    %18 = vector.load %arg6[%c0_12, %c0_13] : memref<128x128xbf16, #tpu.memory_space<vmem>>, vector<128x128xbf16>
    %cst_14 = arith.constant dense<0.000000e+00> : vector<128x128xf32>
    %19 = tpu.matmul %17, %18, %cst_14 {dimension_numbers = #tpu.dot_dimension_numbers<[1], [0], [0], [1], [0, 0, 1, 1], [], []>} : vector<128x128xbf16>, vector<128x128xbf16>, vector<128x128xf32> -> vector<128x128xf32>
    %c0_15 = arith.constant 0 : index
    %c0_16 = arith.constant 0 : index
    %20 = vector.load %arg7[%c0_15, %c0_16] : memref<1x128xf32, #tpu.memory_space<vmem>>, vector<1x128xf32>
    %21 = vector.broadcast %20 : vector<1x128xf32> to vector<128x128xf32>
    %22 = arith.addf %19, %21 : vector<128x128xf32>
    %cst_17 = arith.constant 0.000000e+00 : f32
    %23 = vector.broadcast %cst_17 : f32 to vector<128x128xf32>
    %24 = arith.maximumf %22, %23 : vector<128x128xf32>
    %25 = arith.truncf %24 : vector<128x128xf32> to vector<128x128xbf16>
    %c0_18 = arith.constant 0 : index
    %c0_19 = arith.constant 0 : index
    %26 = vector.load %arg8[%c0_18, %c0_19] : memref<128x128xbf16, #tpu.memory_space<vmem>>, vector<128x128xbf16>
    %cst_20 = arith.constant dense<0.000000e+00> : vector<128x128xf32>
    %27 = tpu.matmul %25, %26, %cst_20 {dimension_numbers = #tpu.dot_dimension_numbers<[1], [0], [0], [1], [0, 0, 1, 1], [], []>} : vector<128x128xbf16>, vector<128x128xbf16>, vector<128x128xf32> -> vector<128x128xf32>
    %c0_21 = arith.constant 0 : index
    %c0_22 = arith.constant 0 : index
    %28 = vector.load %arg9[%c0_21, %c0_22] : memref<1x128xf32, #tpu.memory_space<vmem>>, vector<1x128xf32>
    %29 = vector.broadcast %28 : vector<1x128xf32> to vector<128x128xf32>
    %30 = arith.addf %27, %29 : vector<128x128xf32>
    %cst_23 = arith.constant 0.000000e+00 : f32
    %31 = vector.broadcast %cst_23 : f32 to vector<128x128xf32>
    %32 = arith.maximumf %30, %31 : vector<128x128xf32>
    %c0_24 = arith.constant 0 : index
    %c0_25 = arith.constant 0 : index
    %33 = vector.load %arg10[%c0_24, %c0_25] : memref<128x128xbf16, #tpu.memory_space<vmem>>, vector<128x128xbf16>
    tpu.vector_store %arg10[%c0_24, %c0_25], %25 {strides = array<i32>} : memref<128x128xbf16, #tpu.memory_space<vmem>>, vector<128x128xbf16>,
    %34 = arith.truncf %32 : vector<128x128xf32> to vector<128x128xbf16>
    %c0_26 = arith.constant 0 : index
    %c0_27 = arith.constant 0 : index
    %35 = vector.load %arg11[%c0_26, %c0_27] : memref<128x128xbf16, #tpu.memory_space<vmem>>, vector<128x128xbf16>
    tpu.vector_store %arg11[%c0_26, %c0_27], %34 {strides = array<i32>} : memref<128x128xbf16, #tpu.memory_space<vmem>>, vector<128x128xbf16>,
    return
  }
  func.func @transform_0(%arg0: i32) -> (i32, i32) {
    %c0_i32 = arith.constant 0 : i32
    %c0_i32_0 = arith.constant 0 : i32
    return %arg0, %c0_i32 : i32, i32
  }
  func.func @transform_1(%arg0: i32) -> (i32, i32) {
    %c0_i32 = arith.constant 0 : i32
    %c0_i32_0 = arith.constant 0 : i32
    %c0_i32_1 = arith.constant 0 : i32
    return %c0_i32, %c0_i32_0 : i32, i32
  }
  func.func @transform_2(%arg0: i32) -> (i32, i32) {
    %c0_i32 = arith.constant 0 : i32
    %c0_i32_0 = arith.constant 0 : i32
    %c0_i32_1 = arith.constant 0 : i32
    return %c0_i32, %c0_i32_0 : i32, i32
  }
  func.func @transform_3(%arg0: i32) -> (i32, i32) {
    %c0_i32 = arith.constant 0 : i32
    %c0_i32_0 = arith.constant 0 : i32
    %c0_i32_1 = arith.constant 0 : i32
    return %c0_i32, %c0_i32_0 : i32, i32
  }
  func.func @transform_4(%arg0: i32) -> (i32, i32) {
    %c0_i32 = arith.constant 0 : i32
    %c0_i32_0 = arith.constant 0 : i32
    %c0_i32_1 = arith.constant 0 : i32
    return %c0_i32, %c0_i32_0 : i32, i32
  }
  func.func @transform_5(%arg0: i32) -> (i32, i32) {
    %c0_i32 = arith.constant 0 : i32
    %c0_i32_0 = arith.constant 0 : i32
    %c0_i32_1 = arith.constant 0 : i32
    return %c0_i32, %c0_i32_0 : i32, i32
  }
  func.func @transform_6(%arg0: i32) -> (i32, i32) {
    %c0_i32 = arith.constant 0 : i32
    %c0_i32_0 = arith.constant 0 : i32
    %c0_i32_1 = arith.constant 0 : i32
    return %c0_i32, %c0_i32_0 : i32, i32
  }
  func.func @transform_7(%arg0: i32) -> (i32, i32) {
    %c0_i32 = arith.constant 0 : i32
    %c0_i32_0 = arith.constant 0 : i32
    %c0_i32_1 = arith.constant 0 : i32
    return %c0_i32, %c0_i32_0 : i32, i32
  }
  func.func @transform_8(%arg0: i32) -> (i32, i32) {
    %c0_i32 = arith.constant 0 : i32
    %c0_i32_0 = arith.constant 0 : i32
    %c0_i32_1 = arith.constant 0 : i32
    return %c0_i32, %c0_i32_0 : i32, i32
  }
  func.func @transform_9(%arg0: i32) -> (i32, i32) {
    %c0_i32 = arith.constant 0 : i32
    %c0_i32_0 = arith.constant 0 : i32
    return %arg0, %c0_i32 : i32, i32
  }
  func.func @transform_10(%arg0: i32) -> (i32, i32) {
    %c0_i32 = arith.constant 0 : i32
    %c0_i32_0 = arith.constant 0 : i32
    return %arg0, %c0_i32 : i32, i32
  }
}

</mosaic_0001>

<bundles_post_ra>
// kernel: gnnca_forward.5
= control target key start
LH: loop header
LB: loop body
LE: loop exit
PB: predicated region body
PF: predicated region fallthrough
CT: control target
= control target key end

     0   :  { %s1884_s2 = inlined_call_operand.vmem [shape: bf16[128,128], index: 2, kind: input, shape index: {}]   ;;  %s1885_s0 = inlined_call_operand.vmem [shape: bf16[128,128], index: 0, kind: input, shape index: {}]   ;;  %s1886_s3 = inlined_call_operand.vmem [shape: bf16[128,128], index: 3, kind: input, shape index: {}]   ;;  %s1887_s4 = inlined_call_operand.vmem [shape: bf16[128,128], index: 4, kind: input, shape index: {}]   ;;  %s1888_s1 = inlined_call_operand.vmem [shape: bf16[128,128], index: 1, kind: input, shape index: {}]   ;;  %s1889_s6 = inlined_call_operand.vmem [shape: bf16[128,128], index: 6, kind: input, shape index: {}]   ;;  %s1890_s8 = inlined_call_operand.vmem [shape: bf16[128,128], index: 8, kind: input, shape index: {}]   ;;  %s1891_s5 = inlined_call_operand.vmem [shape: f32[1,128], index: 5, kind: input, shape index: {}]   ;;  %s1892_s7 = inlined_call_operand.vmem [shape: f32[1,128], index: 7, kind: input, shape index: {}]   ;;  %s1893_s9 = inlined_call_operand.vmem [shape: f32[1,128], index: 9, kind: input, shape index: {}]   ;;  %s1894_s10 = inlined_call_operand.vmem [shape: f32[128,128], index: 10, kind: output, shape index: {}]  }
   0x1   :  { %v1500_v0 = vld [vmem:[%s1884_s2 + $0x38] sm:$0xff]   ;;  %v1501_v1 = vld [vmem:[%s1884_s2 + $0x30] sm:$0xff]   ;;  %v1502_v2 = vld [vmem:[%s1884_s2 + $0x28] sm:$0xff]  }
   0x2   :  { %1324 = vmatprep.subr.bf16.mxu0 %v1500_v0  ;;  %v1503_v3 = vld [vmem:[%s1884_s2 + $0x20] sm:$0xff]   ;;  %v1504_v5 = vld [vmem:[%s1884_s2 + $0x18] sm:$0xff]   ;;  %v1505_v6 = vld [vmem:[%s1884_s2 + $0x10] sm:$0xff]  }
   0x3   :  { %1325 = vmatpush3.bf16.msra.mxu0 %v1500_v0  ;;  %v1508_v4 = vld [vmem:[%s1885_s0] sm:$0xff]   ;;  %v1518_v7 = vld [vmem:[%s1887_s4 + $0x38] sm:$0xff]   ;;  %v1506_v8 = vld [vmem:[%s1884_s2 + $0x8] sm:$0xff]  }
   0x4   :  { %1326 = vmatprep.subr.bf16.mxu0 %v1501_v1  ;;  %1340 = vmatprep.mubr.bf16.mxu0 %v1508_v4  ;;  %v1520_v9 = vld [vmem:[%s1887_s4 + $0x30] sm:$0xff]   ;;  %v1522_v10 = vld [vmem:[%s1887_s4 + $0x28] sm:$0xff]   ;;  %v1507_v11 = vld [vmem:[%s1884_s2] sm:$0xff]  }
   0x5   :  { %1356 = vmatprep.subr.bf16.mxu1 %v1518_v7  ;;  %v1524_v12 = vld [vmem:[%s1887_s4 + $0x20] sm:$0xff]   ;;  %v1516_v13 = vld [vmem:[%s1886_s3 + $0x38] sm:$0xff]   ;;  %v1509_v14 = vld [vmem:[%s1885_s0 + $0x8] sm:$0xff]  }
   0x6   :  { %1357 = vmatpush3.bf16.msra.mxu1 %v1518_v7  ;;  %v1526_v15 = vld [vmem:[%s1887_s4 + $0x18] sm:$0xff]   ;;  %v1510_v16 = vld [vmem:[%s1885_s0 + $0x10] sm:$0xff]   ;;  %v1519_v19 = vld [vmem:[%s1886_s3 + $0x28] sm:$0xff]  }
   0x7   :  { %1327 = vmatpush3.bf16.msra.mxu0 %v1501_v1  ;;  %1358 = vmatprep.subr.bf16.mxu1 %v1520_v9  ;;  %v1517_v17 = vld [vmem:[%s1886_s3 + $0x30] sm:$0xff]   ;;  %v1511_v20 = vld [vmem:[%s1885_s0 + $0x18] sm:$0xff]   ;;  %v1512_v21 = vld [vmem:[%s1885_s0 + $0x20] sm:$0xff]  }
   0x8   :  { %1328 = vmatprep.subr.bf16.mxu0 %v1502_v2  ;;  %v1528_v18 = vld [vmem:[%s1887_s4 + $0x10] sm:$0xff]   ;;  %v1521_v22 = vld [vmem:[%s1886_s3 + $0x20] sm:$0xff]   ;;  %v1523_v23 = vld [vmem:[%s1886_s3 + $0x18] sm:$0xff]  }
   0x9   :  { %v1513_v24 = vld [vmem:[%s1885_s0 + $0x28] sm:$0xff]   ;;  %v1514_v25 = vld [vmem:[%s1885_s0 + $0x30] sm:$0xff]   ;;  %v1515_v28 = vld [vmem:[%s1885_s0 + $0x38] sm:$0xff]  }
   0xa   :  { %1359 = vmatpush3.bf16.msra.mxu1 %v1520_v9  ;;  %v1525_v26 = vld [vmem:[%s1886_s3 + $0x10] sm:$0xff]   ;;  %v1527_v27 = vld [vmem:[%s1886_s3 + $0x8] sm:$0xff]   ;;  %v1529_v29 = vld [vmem:[%s1886_s3] sm:$0xff]  }
   0xb   :  { %1329 = vmatpush3.bf16.msra.mxu0 %v1502_v2  ;;  %1360 = vmatprep.subr.bf16.mxu1 %v1522_v10  ;;  %v1530_v30 = vld [vmem:[%s1887_s4 + $0x8] sm:$0xff]   ;;  %v1531_v31 = vld [vmem:[%s1888_s1] sm:$0xff]   ;;  %v1534_v34 = vld [vmem:[%s1888_s1 + $0x10] sm:$0xff]  }
   0xc   :  { %1330 = vmatprep.subr.bf16.mxu0 %v1503_v3  ;;  %v1532_v32 = vld [vmem:[%s1888_s1 + $0x8] sm:$0xff]   ;;  %v1533_v33 = vld [vmem:[%s1887_s4] sm:$0xff]   ;;  %v1535_v35 = vld [vmem:[%s1888_s1 + $0x18] sm:$0xff]  }
   0xd   :  { %v1536_v36 = vld [vmem:[%s1888_s1 + $0x20] sm:$0xff]   ;;  %v1537_v37 = vld [vmem:[%s1888_s1 + $0x28] sm:$0xff]   ;;  %v1538_v38 = vld [vmem:[%s1888_s1 + $0x30] sm:$0xff]  }
   0xe   :  { %1361 = vmatpush3.bf16.msra.mxu1 %v1522_v10  ;;  %v1539_v39 = vld [vmem:[%s1888_s1 + $0x38] sm:$0xff]   ;;  %v1541_v48 = vld [vmem:[%s1889_s6 + $0x30] sm:$0xff]   ;;  %v1542_v51 = vld [vmem:[%s1889_s6 + $0x28] sm:$0xff]  }
   0xf   :  { %1331 = vmatpush3.bf16.msra.mxu0 %v1503_v3  ;;  %1362 = vmatprep.subr.bf16.mxu1 %v1524_v12  ;;  %v1540_v40 = vld [vmem:[%s1889_s6 + $0x38] sm:$0xff]   ;;  %v1543_v56 = vld [vmem:[%s1889_s6 + $0x20] sm:$0xff]   ;;  %v1763_v9 = vld [vmem:[%s1890_s8 + $0x30] sm:$0xff]  }
  0x10   :  { %1332 = vmatprep.subr.bf16.mxu0 %v1504_v5  ;;  %v1544_v59 = vld [vmem:[%s1889_s6 + $0x18] sm:$0xff]   ;;  %v1547_v7 = vld [vmem:[%s1889_s6] sm:$0xff]   ;;  %v1772_v10 = vld [vmem:[%s1890_s8 + $0x28] sm:$0xff]  }
  0x12   :  { %1363 = vmatpush3.bf16.msra.mxu1 %v1524_v12  ;;  %v1786_v12 = vld [vmem:[%s1890_s8 + $0x18] sm:$0xff]  }
  0x13   :  { %1333 = vmatpush3.bf16.msra.mxu0 %v1504_v5  ;;  %1364 = vmatprep.subr.bf16.mxu1 %v1526_v15  ;;  %v1545_v5 = vld [vmem:[%s1889_s6 + $0x10] sm:$0xff]  }
  0x14   :  { %1334 = vmatprep.subr.bf16.mxu0 %v1505_v6 }
  0x16   :  { %1365 = vmatpush3.bf16.msra.mxu1 %v1526_v15 }
  0x17   :  { %1335 = vmatpush3.bf16.msra.mxu0 %v1505_v6  ;;  %1366 = vmatprep.subr.bf16.mxu1 %v1528_v18  ;;  %v1546_v6 = vld [vmem:[%s1889_s6 + $0x8] sm:$0xff]  }
  0x18   :  { %1336 = vmatprep.subr.bf16.mxu0 %v1506_v8 }
  0x1a   :  { %1367 = vmatpush3.bf16.msra.mxu1 %v1528_v18 }
  0x1b   :  { %1337 = vmatpush3.bf16.msra.mxu0 %v1506_v8  ;;  %1368 = vmatprep.subr.bf16.mxu1 %v1530_v30  ;;  %v1758_v8 = vld [vmem:[%s1890_s8 + $0x38] sm:$0xff]  }
  0x1c   :  { %1338 = vmatprep.subr.bf16.mxu0 %v1507_v11 }
  0x1e   :  { %1369 = vmatpush3.bf16.msra.mxu1 %v1530_v30 }
  0x1f   :  { %1339 = vmatpush3.bf16.msra.mxu0 %v1507_v11  ;;  %1370 = vmatprep.subr.bf16.mxu1 %v1533_v33  ;;  %v1779_v11 = vld [vmem:[%s1890_s8 + $0x20] sm:$0xff]  }
  0x20   :  { %1388 = vmatprep.subr.bf16.mxu0 %v1516_v13 }
  0x22   :  { %1341 = vmatmul.mubr.bf16.vlgmr.msra.gmra.mxu0 %v1509_v14  ;;  %1371 = vmatpush3.bf16.msra.mxu1 %v1533_v33 }
  0x23   :  { %1344 = vmatprep.mubr.bf16.mxu0 %v1510_v16  ;;  %1389 = vmatpush3.bf16.msra.mxu0 %v1516_v13 }
  0x24   :  { %1390 = vmatprep.subr.bf16.mxu0 %v1517_v17  ;;  %1420 = vmatprep.subr.bf16.mxu1 %v1540_v40 }
  0x27   :  { %1391 = vmatpush3.bf16.msra.mxu0 %v1517_v17 }
  0x28   :  { %1392 = vmatprep.subr.bf16.mxu0 %v1519_v19 }
  0x2a   :  { %1345 = vmatmul.mubr.bf16.gmra.mxu0 %v1511_v20 }
  0x2b   :  { %1348 = vmatprep.mubr.bf16.mxu0 %v1512_v21  ;;  %1393 = vmatpush3.bf16.msra.mxu0 %v1519_v19 }
  0x2c   :  { %1394 = vmatprep.subr.bf16.mxu0 %v1521_v22 }
  0x2f   :  { %1395 = vmatpush3.bf16.msra.mxu0 %v1521_v22 }
  0x30   :  { %1396 = vmatprep.subr.bf16.mxu0 %v1523_v23 }
  0x32   :  { %1349 = vmatmul.mubr.bf16.gmra.mxu0 %v1513_v24 }
  0x33   :  { %1352 = vmatprep.mubr.bf16.mxu0 %v1514_v25  ;;  %1397 = vmatpush3.bf16.msra.mxu0 %v1523_v23 }
  0x34   :  { %1398 = vmatprep.subr.bf16.mxu0 %v1525_v26 }
  0x37   :  { %1399 = vmatpush3.bf16.msra.mxu0 %v1525_v26 }
  0x38   :  { %1400 = vmatprep.subr.bf16.mxu0 %v1527_v27 }
  0x3a   :  { %1353 = vmatmul.mubr.bf16.gmra.mxu0 %v1515_v28 }
  0x3b   :  { %1401 = vmatpush3.bf16.msra.mxu0 %v1527_v27  ;;  %1404 = vmatprep.mubr.bf16.mxu0 %v1531_v31  ;;  %v1794_v27 = vld [vmem:[%s1891_s5] ss:$0 sm:$0xff] }
  0x3c   :  { %1402 = vmatprep.subr.bf16.mxu0 %v1529_v29 }
  0x3f   :  { %1403 = vmatpush3.bf16.msra.mxu0 %v1529_v29 }
  0x40   :  { %1452 = vmatprep.subr.bf16.mxu0 %v1758_v8 }
  0x42   :  { %1405 = vmatmul.mubr.bf16.vlgmr.msra.gmra.mxu0 %v1532_v32 }
  0x43   :  { %1408 = vmatprep.mubr.bf16.mxu0 %v1534_v34  ;;  %1453 = vmatpush3.bf16.msra.mxu0 %v1758_v8 }
  0x44   :  { %1454 = vmatprep.subr.bf16.mxu0 %v1763_v9 }
  0x47   :  { %1455 = vmatpush3.bf16.msra.mxu0 %v1763_v9 }
  0x48   :  { %1456 = vmatprep.subr.bf16.mxu0 %v1772_v10 }
  0x4a   :  { %1409 = vmatmul.mubr.bf16.gmra.mxu0 %v1535_v35 }
  0x4b   :  { %1412 = vmatprep.mubr.bf16.mxu0 %v1536_v36  ;;  %1457 = vmatpush3.bf16.msra.mxu0 %v1772_v10 }
  0x4c   :  { %1458 = vmatprep.subr.bf16.mxu0 %v1779_v11 }
  0x4f   :  { %1459 = vmatpush3.bf16.msra.mxu0 %v1779_v11 }
  0x50   :  { %1460 = vmatprep.subr.bf16.mxu0 %v1786_v12 }
  0x52   :  { %1413 = vmatmul.mubr.bf16.gmra.mxu0 %v1537_v37 }
  0x53   :  { %1416 = vmatprep.mubr.bf16.mxu0 %v1538_v38  ;;  %1461 = vmatpush3.bf16.msra.mxu0 %v1786_v12 }
  0x5a   :  { %1417 = vmatmul.mubr.bf16.gmra.mxu0 %v1539_v39 }
  0xe2   :  { %v1342_v41 = vpop.f32.mrf.mxu0 }
  0xe4   :  { %v234_v42 = vpop.f32.mrf.mxu0 }
  0xe6   :  { %v1343_v43 = vpop.f32.mrf.mxu0 }
  0xe7   :  { %v349_v46 = vpack.c.bf16 %v1343_v43, %v1342_v41 }
  0xe8   :  { %v237_v44 = vpop.f32.mrf.mxu0 }
  0xe9   :  { %v348_v45 = vpack.c.bf16 %v237_v44, %v234_v42 }
  0xea   :  { %v1346_v47 = vpop.f32.mrf.mxu0 }
  0xeb   :  { %1372 = vmatprep.mubr.bf16.mxu1 %v348_v45 }
  0xec   :  { %v250_v49 = vpop.f32.mrf.mxu0  ;;  %1373 = vmatmul.mubr.bf16.vlgmr.msra.gmra.mxu1 %v349_v46 }
  0xed   :  { %1421 = vmatpush3.bf16.msra.mxu1 %v1540_v40 }
  0xee   :  { %v1347_v50 = vpop.f32.mrf.mxu0  ;;  %1422 = vmatprep.subr.bf16.mxu1 %v1541_v48 }
  0xef   :  { %v351_v54 = vpack.c.bf16 %v1347_v50, %v1346_v47 }
  0xf0   :  { %v253_v52 = vpop.f32.mrf.mxu0 }
  0xf1   :  { %v350_v53 = vpack.c.bf16 %v253_v52, %v250_v49  ;;  %1423 = vmatpush3.bf16.msra.mxu1 %v1541_v48 }
  0xf2   :  { %v1350_v55 = vpop.f32.mrf.mxu0  ;;  %1424 = vmatprep.subr.bf16.mxu1 %v1542_v51 }
  0xf3   :  { %1376 = vmatprep.mubr.bf16.mxu1 %v350_v53 }
  0xf4   :  { %v266_v57 = vpop.f32.mrf.mxu0  ;;  %1377 = vmatmul.mubr.bf16.gmra.mxu1 %v351_v54 }
  0xf5   :  { %1425 = vmatpush3.bf16.msra.mxu1 %v1542_v51 }
  0xf6   :  { %v1351_v58 = vpop.f32.mrf.mxu0  ;;  %1426 = vmatprep.subr.bf16.mxu1 %v1543_v56 }
  0xf7   :  { %v353_v62 = vpack.c.bf16 %v1351_v58, %v1350_v55 }
  0xf8   :  { %v269_v60 = vpop.f32.mrf.mxu0 }
  0xf9   :  { %v352_v61 = vpack.c.bf16 %v269_v60, %v266_v57  ;;  %1427 = vmatpush3.bf16.msra.mxu1 %v1543_v56 }
  0xfa   :  { %v1354_v63 = vpop.f32.mrf.mxu0  ;;  %1428 = vmatprep.subr.bf16.mxu1 %v1544_v59 }
  0xfb   :  { %1380 = vmatprep.mubr.bf16.mxu1 %v352_v61 }
  0xfc   :  { %v282_v0 = vpop.f32.mrf.mxu0  ;;  %1381 = vmatmul.mubr.bf16.gmra.mxu1 %v353_v62 }
  0xfd   :  { %1429 = vmatpush3.bf16.msra.mxu1 %v1544_v59 }
  0xfe   :  { %v1355_v1 = vpop.f32.mrf.mxu0  ;;  %1430 = vmatprep.subr.bf16.mxu1 %v1545_v5 }
  0xff   :  { %v355_v4 = vpack.c.bf16 %v1355_v1, %v1354_v63 }
 0x100   :  { %v285_v2 = vpop.f32.mrf.mxu0 }
 0x101   :  { %v354_v3 = vpack.c.bf16 %v285_v2, %v282_v0  ;;  %1431 = vmatpush3.bf16.msra.mxu1 %v1545_v5 }
 0x102   :  { %1432 = vmatprep.subr.bf16.mxu1 %v1546_v6  ;;  %v1406_v13 = vpop.f32.mrf.mxu0 }
 0x103   :  { %1384 = vmatprep.mubr.bf16.mxu1 %v354_v3 }
 0x104   :  { %1385 = vmatmul.mubr.bf16.gmra.mxu1 %v355_v4  ;;  %v679_v14 = vpop.f32.mrf.mxu0 }
 0x105   :  { %1433 = vmatpush3.bf16.msra.mxu1 %v1546_v6 }
 0x106   :  { %1434 = vmatprep.subr.bf16.mxu1 %v1547_v7  ;;  %v1407_v15 = vpop.f32.mrf.mxu0 }
 0x108   :  { %v682_v16 = vpop.f32.mrf.mxu0 }
 0x109   :  { %1435 = vmatpush3.bf16.msra.mxu1 %v1547_v7 }
 0x10a   :  { %1484 = vmatprep.subr.bf16.mxu1 %v1758_v8  ;;  %v1410_v17 = vpop.f32.mrf.mxu0 }
 0x10c   :  { %v695_v18 = vpop.f32.mrf.mxu0 }
 0x10e   :  { %v1411_v19 = vpop.f32.mrf.mxu0 }
 0x110   :  { %v698_v20 = vpop.f32.mrf.mxu0 }
 0x112   :  { %v1414_v23 = vpop.f32.mrf.mxu0 }
 0x114   :  { %v711_v30 = vpop.f32.mrf.mxu0 }
 0x116   :  { %v1415_v39 = vpop.f32.mrf.mxu0 }
 0x118   :  { %v714_v50 = vpop.f32.mrf.mxu0 }
 0x11a   :  { %v1418_v59 = vpop.f32.mrf.mxu0 }
 0x11c   :  { %v727_v4 = vpop.f32.mrf.mxu0 }
 0x1ac   :  { %v1374_v21 = vpop.f32.mrf.mxu1 }
 0x1ad   :  { %v688_v25 = vadd.f32 %v1406_v13, %v1374_v21 }
 0x1ae   :  { %v486_v22 = vpop.f32.mrf.mxu1 }
 0x1af   :  { %v680_v24 = vadd.f32 %v679_v14, %v486_v22  ;;  %v751_v34 = vadd.f32 %v1794_v27, %v688_v25 }
 0x1b0   :  { %v1375_v26 = vpop.f32.mrf.mxu1 }
 0x1b1   :  { %v691_v28 = vadd.f32 %v1407_v15, %v1375_v26  ;;  %v749_v31 = vadd.f32 %v1794_v27, %v680_v24  ;;  %v767_v43 = vmax.f32 %v751_v34, 0.0 }
 0x1b2   :  { %v489_v29 = vpop.f32.mrf.mxu1 }
 0x1b3   :  { %v752_v32 = vadd.f32 %v1794_v27, %v691_v28  ;;  %v683_v33 = vadd.f32 %v682_v16, %v489_v29  ;;  %v765_v40 = vmax.f32 %v749_v31, 0.0 }
 0x1b4   :  { %v1378_v35 = vpop.f32.mrf.mxu1 }
 0x1b5   :  { %v750_v36 = vadd.f32 %v1794_v27, %v683_v33  ;;  %v768_v37 = vmax.f32 %v752_v32, 0.0  ;;  %v704_v44 = vadd.f32 %v1410_v17, %v1378_v35  ;;  %v1419_v17 = vpop.f32.mrf.mxu0 }
 0x1b6   :  { %v502_v38 = vpop.f32.mrf.mxu1 }
 0x1b7   :  { %v766_v41 = vmax.f32 %v750_v36, 0.0  ;;  %v696_v42 = vadd.f32 %v695_v18, %v502_v38  ;;  %v782_v48 = vpack.c.bf16 %v768_v37, %v767_v43  ;;  %v755_v54 = vadd.f32 %v1794_v27, %v704_v44  ;;  %v730_v28 = vpop.f32.mrf.mxu0  ;;  %v1226_v43 = vld [vmem:[%s1892_s7] ss:$0 sm:$0xff] }
 0x1b8   :  { %v1379_v45 = vpop.f32.mrf.mxu1 }
 0x1b9   :  { %v707_v46 = vadd.f32 %v1411_v19, %v1379_v45  ;;  %v781_v47 = vpack.c.bf16 %v766_v41, %v765_v40  ;;  %v753_v51 = vadd.f32 %v1794_v27, %v696_v42  ;;  %v771_v63 = vmax.f32 %v755_v54, 0.0  ;;  %v1553_v40 = vld [vmem:[%s1890_s8 + $0x10] sm:$0xff]  }
 0x1ba   :  { %v505_v49 = vpop.f32.mrf.mxu1  ;;  %1462 = vmatprep.subr.bf16.mxu0 %v1553_v40 }
 0x1bb   :  { %v756_v52 = vadd.f32 %v1794_v27, %v707_v46  ;;  %v699_v53 = vadd.f32 %v698_v20, %v505_v49  ;;  %1436 = vmatprep.mubr.bf16.mxu1 %v781_v47  ;;  %v769_v60 = vmax.f32 %v753_v51, 0.0  ;;  %1463 = vmatpush3.bf16.msra.mxu0 %v1553_v40 }
 0x1bc   :  { %v1382_v55 = vpop.f32.mrf.mxu1  ;;  %1437 = vmatmul.mubr.bf16.vlgmr.msra.gmra.mxu1 %v782_v48 }
 0x1bd   :  { %v754_v56 = vadd.f32 %v1794_v27, %v699_v53  ;;  %1492 = vmatpush3.bf16.msra.mxu1 %v1758_v8  ;;  %v772_v57 = vmax.f32 %v756_v52, 0.0  ;;  %v720_v0 = vadd.f32 %v1414_v23, %v1382_v55 }
 0x1be   :  { %v518_v58 = vpop.f32.mrf.mxu1  ;;  %1485 = vmatprep.subr.bf16.mxu1 %v1763_v9 }
 0x1bf   :  { %v770_v61 = vmax.f32 %v754_v56, 0.0  ;;  %v712_v62 = vadd.f32 %v711_v30, %v518_v58  ;;  %v784_v6 = vpack.c.bf16 %v772_v57, %v771_v63  ;;  %v759_v14 = vadd.f32 %v1794_v27, %v720_v0 }
 0x1c0   :  { %v1383_v1 = vpop.f32.mrf.mxu1 }
 0x1c1   :  { %v723_v2 = vadd.f32 %v1415_v39, %v1383_v1  ;;  %v783_v3 = vpack.c.bf16 %v770_v61, %v769_v60  ;;  %1493 = vmatpush3.bf16.msra.mxu1 %v1763_v9  ;;  %v757_v7 = vadd.f32 %v1794_v27, %v712_v62  ;;  %v775_v22 = vmax.f32 %v759_v14, 0.0 }
 0x1c2   :  { %v521_v5 = vpop.f32.mrf.mxu1  ;;  %1486 = vmatprep.subr.bf16.mxu1 %v1772_v10 }
 0x1c3   :  { %v760_v8 = vadd.f32 %v1794_v27, %v723_v2  ;;  %v715_v13 = vadd.f32 %v714_v50, %v521_v5  ;;  %1440 = vmatprep.mubr.bf16.mxu1 %v783_v3  ;;  %v773_v19 = vmax.f32 %v757_v7, 0.0 }
 0x1c4   :  { %v1386_v15 = vpop.f32.mrf.mxu1  ;;  %1441 = vmatmul.mubr.bf16.gmra.mxu1 %v784_v6 }
 0x1c5   :  { %v758_v16 = vadd.f32 %v1794_v27, %v715_v13  ;;  %1494 = vmatpush3.bf16.msra.mxu1 %v1772_v10  ;;  %v776_v9 = vmax.f32 %v760_v8, 0.0  ;;  %v736_v23 = vadd.f32 %v1418_v59, %v1386_v15 }
 0x1c6   :  { %v534_v18 = vpop.f32.mrf.mxu1  ;;  %1487 = vmatprep.subr.bf16.mxu1 %v1779_v11 }
 0x1c7   :  { %v774_v20 = vmax.f32 %v758_v16, 0.0  ;;  %v728_v21 = vadd.f32 %v727_v4, %v534_v18  ;;  %v786_v30 = vpack.c.bf16 %v776_v9, %v775_v22  ;;  %v763_v33 = vadd.f32 %v1794_v27, %v736_v23 }
 0x1c8   :  { %v1387_v24 = vpop.f32.mrf.mxu1 }
 0x1c9   :  { %v739_v25 = vadd.f32 %v1419_v17, %v1387_v24  ;;  %v785_v26 = vpack.c.bf16 %v774_v20, %v773_v19  ;;  %1495 = vmatpush3.bf16.msra.mxu1 %v1779_v11  ;;  %v761_v10 = vadd.f32 %v1794_v27, %v728_v21  ;;  %v779_v37 = vmax.f32 %v763_v33, 0.0 }
 0x1ca   :  { %v537_v29 = vpop.f32.mrf.mxu1  ;;  %1488 = vmatprep.subr.bf16.mxu1 %v1786_v12 }
 0x1cb   :  { %v764_v31 = vadd.f32 %v1794_v27, %v739_v25  ;;  %v731_v32 = vadd.f32 %v730_v28, %v537_v29  ;;  %1444 = vmatprep.mubr.bf16.mxu1 %v785_v26  ;;  %v777_v11 = vmax.f32 %v761_v10, 0.0 }
 0x1cc   :  { %1445 = vmatmul.mubr.bf16.gmra.mxu1 %v786_v30 }
 0x1cd   :  { %v762_v34 = vadd.f32 %v1794_v27, %v731_v32  ;;  %1496 = vmatpush3.bf16.msra.mxu1 %v1786_v12  ;;  %v780_v35 = vmax.f32 %v764_v31, 0.0  ;;  %v1554_v12 = vld [vmem:[%s1890_s8 + $0x8] sm:$0xff]   ;;  %v1555_v27 = vld [vmem:[%s1890_s8] sm:$0xff]  }
 0x1ce   :  { %1489 = vmatprep.subr.bf16.mxu1 %v1553_v40  ;;  %1464 = vmatprep.subr.bf16.mxu0 %v1554_v12 }
 0x1cf   :  { %v778_v36 = vmax.f32 %v762_v34, 0.0  ;;  %v788_v39 = vpack.c.bf16 %v780_v35, %v779_v37  ;;  %1465 = vmatpush3.bf16.msra.mxu0 %v1554_v12 }
 0x1d0   :  { %1466 = vmatprep.subr.bf16.mxu0 %v1555_v27 }
 0x1d1   :  { %v787_v38 = vpack.c.bf16 %v778_v36, %v777_v11  ;;  %1497 = vmatpush3.bf16.msra.mxu1 %v1553_v40  ;;  %v1235_v36 = vld [vmem:[%s1893_s9] ss:$0 sm:$0xff] }
 0x1d2   :  { %1490 = vmatprep.subr.bf16.mxu1 %v1554_v12 }
 0x1d3   :  { %1448 = vmatprep.mubr.bf16.mxu1 %v787_v38  ;;  %1467 = vmatpush3.bf16.msra.mxu0 %v1555_v27 }
 0x1d4   :  { %1449 = vmatmul.mubr.bf16.gmra.mxu1 %v788_v39 }
 0x1d5   :  { %1498 = vmatpush3.bf16.msra.mxu1 %v1554_v12 }
 0x1d6   :  { %1491 = vmatprep.subr.bf16.mxu1 %v1555_v27 }
 0x1d9   :  { %1499 = vmatpush3.bf16.msra.mxu1 %v1555_v27 }
 0x27c   :  { %v1438_v41 = vpop.f32.mrf.mxu1 }
 0x27d   :  { %v903_v47 = vadd.f32 %v1438_v41, %v1226_v43 }
 0x27e   :  { %v894_v42 = vpop.f32.mrf.mxu1 }
 0x27f   :  { %v895_v45 = vadd.f32 %v1226_v43, %v894_v42  ;;  %v959_v54 = vmax.f32 %v903_v47, 0.0 }
 0x280   :  { %v1439_v44 = vpop.f32.mrf.mxu1 }
 0x281   :  { %v906_v46 = vadd.f32 %v1439_v44, %v1226_v43  ;;  %v957_v52 = vmax.f32 %v895_v45, 0.0 }
 0x282   :  { %v897_v48 = vpop.f32.mrf.mxu1 }
 0x283   :  { %v898_v49 = vadd.f32 %v1226_v43, %v897_v48  ;;  %v960_v50 = vmax.f32 %v906_v46, 0.0 }
 0x284   :  { %v1442_v51 = vpop.f32.mrf.mxu1 }
 0x285   :  { %v958_v53 = vmax.f32 %v898_v49, 0.0  ;;  %v974_v57 = vpack.c.bf16 %v960_v50, %v959_v54  ;;  %v919_v61 = vadd.f32 %v1442_v51, %v1226_v43 }
 0x286   :  { %v910_v55 = vpop.f32.mrf.mxu1 }
 0x287   :  { %v973_v56 = vpack.c.bf16 %v958_v53, %v957_v52  ;;  %v911_v59 = vadd.f32 %v1226_v43, %v910_v55  ;;  %v963_v4 = vmax.f32 %v919_v61, 0.0 }
 0x288   :  { %v1443_v58 = vpop.f32.mrf.mxu1 }
 0x289   :  { %v922_v60 = vadd.f32 %v1443_v58, %v1226_v43  ;;  %1468 = vmatprep.mubr.bf16.mxu0 %v973_v56  ;;  %v961_v2 = vmax.f32 %v911_v59, 0.0 }
 0x28a   :  { %v913_v62 = vpop.f32.mrf.mxu1  ;;  %1469 = vmatmul.mubr.bf16.vlgmr.msra.gmra.mxu0 %v974_v57 }
 0x28b   :  { %v914_v63 = vadd.f32 %v1226_v43, %v913_v62  ;;  %v964_v0 = vmax.f32 %v922_v60, 0.0 }
 0x28c   :  { %v1446_v1 = vpop.f32.mrf.mxu1 }
 0x28d   :  { %v962_v3 = vmax.f32 %v914_v63, 0.0  ;;  %v976_v7 = vpack.c.bf16 %v964_v0, %v963_v4  ;;  %v935_v15 = vadd.f32 %v1446_v1, %v1226_v43 }
 0x28e   :  { %v926_v5 = vpop.f32.mrf.mxu1 }
 0x28f   :  { %v975_v6 = vpack.c.bf16 %v962_v3, %v961_v2  ;;  %v927_v13 = vadd.f32 %v1226_v43, %v926_v5  ;;  %v967_v21 = vmax.f32 %v935_v15, 0.0 }
 0x290   :  { %v1447_v8 = vpop.f32.mrf.mxu1 }
 0x291   :  { %v938_v14 = vadd.f32 %v1447_v8, %v1226_v43  ;;  %1472 = vmatprep.mubr.bf16.mxu0 %v975_v6  ;;  %v965_v19 = vmax.f32 %v927_v13, 0.0 }
 0x292   :  { %v929_v16 = vpop.f32.mrf.mxu1  ;;  %1473 = vmatmul.mubr.bf16.gmra.mxu0 %v976_v7 }
 0x293   :  { %v930_v9 = vadd.f32 %v1226_v43, %v929_v16  ;;  %v968_v17 = vmax.f32 %v938_v14, 0.0 }
 0x294   :  { %v1450_v18 = vpop.f32.mrf.mxu1 }
 0x295   :  { %v966_v20 = vmax.f32 %v930_v9, 0.0  ;;  %v978_v24 = vpack.c.bf16 %v968_v17, %v967_v21  ;;  %v951_v29 = vadd.f32 %v1450_v18, %v1226_v43 }
 0x296   :  { %v942_v22 = vpop.f32.mrf.mxu1 }
 0x297   :  { %v977_v23 = vpack.c.bf16 %v966_v20, %v965_v19  ;;  %v943_v26 = vadd.f32 %v1226_v43, %v942_v22  ;;  %v971_v34 = vmax.f32 %v951_v29, 0.0 }
 0x298   :  { %v1451_v25 = vpop.f32.mrf.mxu1 }
 0x299   :  { %v954_v28 = vadd.f32 %v1451_v25, %v1226_v43  ;;  %1476 = vmatprep.mubr.bf16.mxu1 %v977_v23  ;;  %v969_v32 = vmax.f32 %v943_v26, 0.0 }
 0x29a   :  { %v945_v30 = vpop.f32.mrf.mxu1  ;;  %1477 = vmatmul.mubr.bf16.vlgmr.msra.gmra.mxu1 %v978_v24 }
 0x29b   :  { %v946_v10 = vadd.f32 %v1226_v43, %v945_v30  ;;  %v972_v31 = vmax.f32 %v954_v28, 0.0 }
 0x29d   :  { %v970_v33 = vmax.f32 %v946_v10, 0.0  ;;  %v980_v11 = vpack.c.bf16 %v972_v31, %v971_v34 }
 0x29f   :  { %v979_v35 = vpack.c.bf16 %v970_v33, %v969_v32 }
 0x2a1   :  { %1480 = vmatprep.mubr.bf16.mxu1 %v979_v35 }
 0x2a2   :  { %1481 = vmatmul.mubr.bf16.gmra.mxu1 %v980_v11 }
 0x34a   :  { %v1470_v37 = vpop.f32.mrf.mxu0 }
 0x34b   :  { %v1095_v38 = vadd.f32 %v1470_v37, %v1235_v36 }
 0x34c   :  { %v1086_v39 = vpop.f32.mrf.mxu0 }
 0x34d   :  { %v1151_v40 = vmax.f32 %v1095_v38, 0.0  ;;  %v1087_v12 = vadd.f32 %v1235_v36, %v1086_v39 }
 0x34e   :  { %v1471_v27 = vpop.f32.mrf.mxu0 }
 0x34f   :  { %1167 = vst [vmem:[%s1894_s10 + $0x10] sm:$0xff] %v1151_v40  ;;  %v1149_v41 = vmax.f32 %v1087_v12, 0.0  ;;  %v1098_v42 = vadd.f32 %v1471_v27, %v1235_v36 }
 0x350   :  { %v1089_v43 = vpop.f32.mrf.mxu0 }
 0x351   :  { %1165 = vst [vmem:[%s1894_s10] sm:$0xff] %v1149_v41  ;;  %v1152_v44 = vmax.f32 %v1098_v42, 0.0  ;;  %v1090_v45 = vadd.f32 %v1235_v36, %v1089_v43 }
 0x352   :  { %v1474_v46 = vpop.f32.mrf.mxu0 }
 0x353   :  { %1168 = vst [vmem:[%s1894_s10 + $0x18] sm:$0xff] %v1152_v44  ;;  %v1150_v47 = vmax.f32 %v1090_v45, 0.0  ;;  %v1111_v48 = vadd.f32 %v1474_v46, %v1235_v36 }
 0x354   :  { %v1102_v49 = vpop.f32.mrf.mxu0 }
 0x355   :  { %1166 = vst [vmem:[%s1894_s10 + $0x8] sm:$0xff] %v1150_v47  ;;  %v1155_v50 = vmax.f32 %v1111_v48, 0.0  ;;  %v1103_v51 = vadd.f32 %v1235_v36, %v1102_v49 }
 0x356   :  { %v1475_v52 = vpop.f32.mrf.mxu0 }
 0x357   :  { %1171 = vst [vmem:[%s1894_s10 + $0x30] sm:$0xff] %v1155_v50  ;;  %v1153_v53 = vmax.f32 %v1103_v51, 0.0  ;;  %v1114_v54 = vadd.f32 %v1475_v52, %v1235_v36 }
 0x358   :  { %v1105_v55 = vpop.f32.mrf.mxu0 }
 0x359   :  { %1169 = vst [vmem:[%s1894_s10 + $0x20] sm:$0xff] %v1153_v53  ;;  %v1156_v56 = vmax.f32 %v1114_v54, 0.0  ;;  %v1106_v57 = vadd.f32 %v1235_v36, %v1105_v55 }
 0x35a   :  { %v1478_v58 = vpop.f32.mrf.mxu1 }
 0x35b   :  { %1172 = vst [vmem:[%s1894_s10 + $0x38] sm:$0xff] %v1156_v56  ;;  %v1154_v59 = vmax.f32 %v1106_v57, 0.0  ;;  %v1127_v60 = vadd.f32 %v1478_v58, %v1235_v36 }
 0x35c   :  { %v1118_v61 = vpop.f32.mrf.mxu1 }
 0x35d   :  { %1170 = vst [vmem:[%s1894_s10 + $0x28] sm:$0xff] %v1154_v59  ;;  %v1159_v62 = vmax.f32 %v1127_v60, 0.0  ;;  %v1119_v63 = vadd.f32 %v1235_v36, %v1118_v61 }
 0x35e   :  { %v1479_v0 = vpop.f32.mrf.mxu1 }
 0x35f   :  { %1175 = vst [vmem:[%s1894_s10 + $0x50] sm:$0xff] %v1159_v62  ;;  %v1157_v1 = vmax.f32 %v1119_v63, 0.0  ;;  %v1130_v2 = vadd.f32 %v1479_v0, %v1235_v36 }
 0x360   :  { %v1121_v3 = vpop.f32.mrf.mxu1 }
 0x361   :  { %1173 = vst [vmem:[%s1894_s10 + $0x40] sm:$0xff] %v1157_v1  ;;  %v1160_v4 = vmax.f32 %v1130_v2, 0.0  ;;  %v1122_v5 = vadd.f32 %v1235_v36, %v1121_v3 }
 0x362   :  { %v1482_v6 = vpop.f32.mrf.mxu1 }
 0x363   :  { %1176 = vst [vmem:[%s1894_s10 + $0x58] sm:$0xff] %v1160_v4  ;;  %v1158_v7 = vmax.f32 %v1122_v5, 0.0  ;;  %v1143_v8 = vadd.f32 %v1482_v6, %v1235_v36 }
 0x364   :  { %v1134_v13 = vpop.f32.mrf.mxu1 }
 0x365   :  { %1174 = vst [vmem:[%s1894_s10 + $0x48] sm:$0xff] %v1158_v7  ;;  %v1163_v14 = vmax.f32 %v1143_v8, 0.0  ;;  %v1135_v15 = vadd.f32 %v1235_v36, %v1134_v13 }
 0x366   :  { %v1483_v16 = vpop.f32.mrf.mxu1 }
 0x367   :  { %1179 = vst [vmem:[%s1894_s10 + $0x70] sm:$0xff] %v1163_v14  ;;  %v1161_v9 = vmax.f32 %v1135_v15, 0.0  ;;  %v1146_v17 = vadd.f32 %v1483_v16, %v1235_v36 }
 0x368   :  { %v1137_v18 = vpop.f32.mrf.mxu1 }
 0x369   :  { %1177 = vst [vmem:[%s1894_s10 + $0x60] sm:$0xff] %v1161_v9  ;;  %v1164_v19 = vmax.f32 %v1146_v17, 0.0  ;;  %v1138_v20 = vadd.f32 %v1235_v36, %v1137_v18 }
 0x36b   :  { %1180 = vst [vmem:[%s1894_s10 + $0x78] sm:$0xff] %v1164_v19  ;;  %v1162_v21 = vmax.f32 %v1138_v20, 0.0 }
 0x36d   :  { %1178 = vst [vmem:[%s1894_s10 + $0x68] sm:$0xff] %v1162_v21 }

// kernel: gnnca_forward.4
= control target key start
LH: loop header
LB: loop body
LE: loop exit
PB: predicated region body
PF: predicated region fallthrough
CT: control target
= control target key end

     0   :  { %s1674_s1 = inlined_call_operand.vmem [shape: bf16[128,128], index: 1, kind: input, shape index: {}]   ;;  %s1675_s0 = inlined_call_operand.vmem [shape: f32[128,128], index: 0, kind: input, shape index: {}]   ;;  %s1676_s3 = inlined_call_operand.vmem [shape: bf16[128,128], index: 3, kind: input, shape index: {}]   ;;  %s1677_s5 = inlined_call_operand.vmem [shape: bf16[128,128], index: 5, kind: input, shape index: {}]   ;;  %s1678_s2 = inlined_call_operand.vmem [shape: f32[1,128], index: 2, kind: input, shape index: {}]   ;;  %s1679_s7 = inlined_call_operand.vmem [shape: bf16[128,128], index: 7, kind: input, shape index: {}]   ;;  %s1680_s4 = inlined_call_operand.vmem [shape: f32[1,128], index: 4, kind: input, shape index: {}]   ;;  %s1681_s6 = inlined_call_operand.vmem [shape: f32[1,128], index: 6, kind: input, shape index: {}]   ;;  %s1682_s9 = inlined_call_operand.vmem [shape: bf16[128,128], index: 9, kind: output, shape index: {0}]   ;;  %s1683_s8 = inlined_call_operand.vmem [shape: f32[1,128], index: 8, kind: input, shape index: {}]   ;;  %s1684_s10 = inlined_call_operand.vmem [shape: bf16[128,128], index: 10, kind: output, shape index: {1}]  }
   0x1   :  { %v1365_v0 = vld [vmem:[%s1674_s1 + $0x38] sm:$0xff]   ;;  %v1366_v1 = vld [vmem:[%s1674_s1 + $0x30] sm:$0xff]   ;;  %v1367_v2 = vld [vmem:[%s1674_s1 + $0x28] sm:$0xff]  }
   0x2   :  { %1237 = vmatprep.subr.bf16.mxu0 %v1365_v0  ;;  %v1368_v3 = vld [vmem:[%s1674_s1 + $0x20] sm:$0xff]   ;;  %v36_v5 = vld [vmem:[%s1675_s0 + $0x8] sm:$0xff]  ;;  %v1369_v7 = vld [vmem:[%s1674_s1 + $0x18] sm:$0xff]  }
   0x3   :  { %1238 = vmatpush3.bf16.msra.mxu0 %v1365_v0  ;;  %v35_v4 = vld [vmem:[%s1675_s0] sm:$0xff]  ;;  %v1373_v8 = vld [vmem:[%s1676_s3 + $0x38] sm:$0xff]   ;;  %v1374_v9 = vld [vmem:[%s1676_s3 + $0x30] sm:$0xff]  }
   0x4   :  { %1239 = vmatprep.subr.bf16.mxu0 %v1366_v1  ;;  %v51_v6 = vpack.c.bf16 %v36_v5, %v35_v4  ;;  %v1370_v10 = vld [vmem:[%s1674_s1 + $0x10] sm:$0xff]   ;;  %1269 = vmatprep.subr.bf16.mxu1 %v1373_v8  ;;  %v1375_v11 = vld [vmem:[%s1676_s3 + $0x28] sm:$0xff]   ;;  %v1376_v13 = vld [vmem:[%s1676_s3 + $0x20] sm:$0xff]  }
   0x5   :  { %1270 = vmatpush3.bf16.msra.mxu1 %v1373_v8  ;;  %v1371_v12 = vld [vmem:[%s1674_s1 + $0x8] sm:$0xff]   ;;  %v1372_v14 = vld [vmem:[%s1674_s1] sm:$0xff]   ;;  %v1377_v15 = vld [vmem:[%s1676_s3 + $0x18] sm:$0xff]  }
   0x6   :  { %1253 = vmatprep.mubr.bf16.mxu0 %v51_v6  ;;  %1271 = vmatprep.subr.bf16.mxu1 %v1374_v9  ;;  %v37_v16 = vld [vmem:[%s1675_s0 + $0x10] sm:$0xff]  ;;  %v38_v17 = vld [vmem:[%s1675_s0 + $0x18] sm:$0xff]  ;;  %v39_v18 = vld [vmem:[%s1675_s0 + $0x20] sm:$0xff] }
   0x7   :  { %1240 = vmatpush3.bf16.msra.mxu0 %v1366_v1  ;;  %v40_v19 = vld [vmem:[%s1675_s0 + $0x28] sm:$0xff]  ;;  %v52_v20 = vpack.c.bf16 %v38_v17, %v37_v16  ;;  %v41_v22 = vld [vmem:[%s1675_s0 + $0x30] sm:$0xff]  ;;  %v42_v23 = vld [vmem:[%s1675_s0 + $0x38] sm:$0xff] }
   0x8   :  { %1241 = vmatprep.subr.bf16.mxu0 %v1367_v2  ;;  %v53_v21 = vpack.c.bf16 %v40_v19, %v39_v18  ;;  %v43_v24 = vld [vmem:[%s1675_s0 + $0x40] sm:$0xff]  ;;  %v44_v25 = vld [vmem:[%s1675_s0 + $0x48] sm:$0xff]  ;;  %v54_v26 = vpack.c.bf16 %v42_v23, %v41_v22  ;;  %v45_v28 = vld [vmem:[%s1675_s0 + $0x50] sm:$0xff] }
   0x9   :  { %1272 = vmatpush3.bf16.msra.mxu1 %v1374_v9  ;;  %v55_v27 = vpack.c.bf16 %v44_v25, %v43_v24  ;;  %v46_v29 = vld [vmem:[%s1675_s0 + $0x58] sm:$0xff]  ;;  %v47_v30 = vld [vmem:[%s1675_s0 + $0x60] sm:$0xff]  ;;  %v48_v31 = vld [vmem:[%s1675_s0 + $0x68] sm:$0xff] }
   0xa   :  { %1273 = vmatprep.subr.bf16.mxu1 %v1375_v11  ;;  %v56_v32 = vpack.c.bf16 %v46_v29, %v45_v28  ;;  %v57_v33 = vpack.c.bf16 %v48_v31, %v47_v30  ;;  %v49_v34 = vld [vmem:[%s1675_s0 + $0x70] sm:$0xff]  ;;  %v50_v35 = vld [vmem:[%s1675_s0 + $0x78] sm:$0xff]  ;;  %v1379_v38 = vld [vmem:[%s1676_s3 + $0x8] sm:$0xff]  }
   0xb   :  { %1242 = vmatpush3.bf16.msra.mxu0 %v1367_v2  ;;  %v58_v36 = vpack.c.bf16 %v50_v35, %v49_v34  ;;  %v1378_v37 = vld [vmem:[%s1676_s3 + $0x10] sm:$0xff]   ;;  %v1380_v39 = vld [vmem:[%s1676_s3] sm:$0xff]   ;;  %v1381_v40 = vld [vmem:[%s1677_s5 + $0x38] sm:$0xff]  }
   0xc   :  { %1243 = vmatprep.subr.bf16.mxu0 %v1368_v3  ;;  %v1382_v41 = vld [vmem:[%s1677_s5 + $0x30] sm:$0xff]   ;;  %v1383_v42 = vld [vmem:[%s1677_s5 + $0x28] sm:$0xff]   ;;  %v1384_v43 = vld [vmem:[%s1677_s5 + $0x20] sm:$0xff]  }
   0xd   :  { %1274 = vmatpush3.bf16.msra.mxu1 %v1375_v11  ;;  %v1385_v44 = vld [vmem:[%s1677_s5 + $0x18] sm:$0xff]   ;;  %v979_v47 = vld [vmem:[%s1678_s2] ss:$0 sm:$0xff] }
   0xe   :  { %1275 = vmatprep.subr.bf16.mxu1 %v1376_v13 }
   0xf   :  { %1244 = vmatpush3.bf16.msra.mxu0 %v1368_v3 }
  0x10   :  { %1245 = vmatprep.subr.bf16.mxu0 %v1369_v7 }
  0x11   :  { %1276 = vmatpush3.bf16.msra.mxu1 %v1376_v13 }
  0x12   :  { %1277 = vmatprep.subr.bf16.mxu1 %v1377_v15 }
  0x13   :  { %1246 = vmatpush3.bf16.msra.mxu0 %v1369_v7 }
  0x14   :  { %1247 = vmatprep.subr.bf16.mxu0 %v1370_v10 }
  0x15   :  { %1278 = vmatpush3.bf16.msra.mxu1 %v1377_v15 }
  0x16   :  { %1279 = vmatprep.subr.bf16.mxu1 %v1378_v37 }
  0x17   :  { %1248 = vmatpush3.bf16.msra.mxu0 %v1370_v10 }
  0x18   :  { %1249 = vmatprep.subr.bf16.mxu0 %v1371_v12 }
  0x19   :  { %1280 = vmatpush3.bf16.msra.mxu1 %v1378_v37 }
  0x1a   :  { %1281 = vmatprep.subr.bf16.mxu1 %v1379_v38 }
  0x1b   :  { %1250 = vmatpush3.bf16.msra.mxu0 %v1371_v12 }
  0x1c   :  { %1251 = vmatprep.subr.bf16.mxu0 %v1372_v14 }
  0x1d   :  { %1282 = vmatpush3.bf16.msra.mxu1 %v1379_v38  ;;  %v1386_v38 = vld [vmem:[%s1677_s5 + $0x10] sm:$0xff]  }
  0x1e   :  { %1283 = vmatprep.subr.bf16.mxu1 %v1380_v39 }
  0x1f   :  { %1252 = vmatpush3.bf16.msra.mxu0 %v1372_v14 }
  0x20   :  { %1301 = vmatprep.subr.bf16.mxu0 %v1381_v40 }
  0x21   :  { %1284 = vmatpush3.bf16.msra.mxu1 %v1380_v39  ;;  %v1387_v39 = vld [vmem:[%s1677_s5 + $0x8] sm:$0xff]  }
  0x22   :  { %1254 = vmatmul.mubr.bf16.vlgmr.msra.gmra.mxu0 %v52_v20 }
  0x23   :  { %1257 = vmatprep.mubr.bf16.mxu0 %v53_v21  ;;  %1302 = vmatpush3.bf16.msra.mxu0 %v1381_v40  ;;  %v1388_v40 = vld [vmem:[%s1677_s5] sm:$0xff]  }
  0x24   :  { %1303 = vmatprep.subr.bf16.mxu0 %v1382_v41 }
  0x27   :  { %1304 = vmatpush3.bf16.msra.mxu0 %v1382_v41  ;;  %v1389_v41 = vld [vmem:[%s1679_s7 + $0x38] sm:$0xff]  }
  0x28   :  { %1305 = vmatprep.subr.bf16.mxu0 %v1383_v42  ;;  %1333 = vmatprep.subr.bf16.mxu1 %v1389_v41 }
  0x2a   :  { %1258 = vmatmul.mubr.bf16.gmra.mxu0 %v54_v26 }
  0x2b   :  { %1261 = vmatprep.mubr.bf16.mxu0 %v55_v27  ;;  %1306 = vmatpush3.bf16.msra.mxu0 %v1383_v42  ;;  %v1390_v42 = vld [vmem:[%s1679_s7 + $0x30] sm:$0xff]  }
  0x2c   :  { %1307 = vmatprep.subr.bf16.mxu0 %v1384_v43 }
  0x2f   :  { %1308 = vmatpush3.bf16.msra.mxu0 %v1384_v43  ;;  %v1391_v43 = vld [vmem:[%s1679_s7 + $0x28] sm:$0xff]  }
  0x30   :  { %1309 = vmatprep.subr.bf16.mxu0 %v1385_v44 }
  0x32   :  { %1262 = vmatmul.mubr.bf16.gmra.mxu0 %v56_v32 }
  0x33   :  { %1265 = vmatprep.mubr.bf16.mxu0 %v57_v33  ;;  %1310 = vmatpush3.bf16.msra.mxu0 %v1385_v44  ;;  %v1392_v44 = vld [vmem:[%s1679_s7 + $0x20] sm:$0xff]  }
  0x34   :  { %1311 = vmatprep.subr.bf16.mxu0 %v1386_v38 }
  0x37   :  { %1312 = vmatpush3.bf16.msra.mxu0 %v1386_v38 }
  0x38   :  { %1313 = vmatprep.subr.bf16.mxu0 %v1387_v39 }
  0x3a   :  { %1266 = vmatmul.mubr.bf16.gmra.mxu0 %v58_v36 }
  0x3b   :  { %1314 = vmatpush3.bf16.msra.mxu0 %v1387_v39  ;;  %v1394_v39 = vld [vmem:[%s1679_s7 + $0x10] sm:$0xff]  }
  0x3c   :  { %1315 = vmatprep.subr.bf16.mxu0 %v1388_v40 }
  0x3f   :  { %1316 = vmatpush3.bf16.msra.mxu0 %v1388_v40  ;;  %v1395_v40 = vld [vmem:[%s1679_s7 + $0x8] sm:$0xff]  }
  0xe2   :  { %v1255_v45 = vpop.f32.mrf.mxu0 }
  0xe3   :  { %v173_v51 = vadd.f32 %v1255_v45, %v979_v47  ;;  %v1393_v45 = vld [vmem:[%s1679_s7 + $0x18] sm:$0xff]  }
  0xe4   :  { %v164_v46 = vpop.f32.mrf.mxu0 }
  0xe5   :  { %v165_v49 = vadd.f32 %v979_v47, %v164_v46  ;;  %v229_v58 = vmax.f32 %v173_v51, 0.0 }
  0xe6   :  { %v1256_v48 = vpop.f32.mrf.mxu0 }
  0xe7   :  { %v176_v50 = vadd.f32 %v1256_v48, %v979_v47  ;;  %v227_v56 = vmax.f32 %v165_v49, 0.0  ;;  %v988_v48 = vld [vmem:[%s1680_s4] ss:$0 sm:$0xff] }
  0xe8   :  { %v167_v52 = vpop.f32.mrf.mxu0 }
  0xe9   :  { %v168_v53 = vadd.f32 %v979_v47, %v167_v52  ;;  %v230_v54 = vmax.f32 %v176_v50, 0.0 }
  0xea   :  { %v1259_v55 = vpop.f32.mrf.mxu0 }
  0xeb   :  { %v228_v57 = vmax.f32 %v168_v53, 0.0  ;;  %v244_v61 = vpack.c.bf16 %v230_v54, %v229_v58  ;;  %v189_v1 = vadd.f32 %v1259_v55, %v979_v47 }
  0xec   :  { %v180_v59 = vpop.f32.mrf.mxu0 }
  0xed   :  { %v243_v60 = vpack.c.bf16 %v228_v57, %v227_v56  ;;  %v181_v63 = vadd.f32 %v979_v47, %v180_v59  ;;  %v233_v8 = vmax.f32 %v189_v1, 0.0 }
  0xee   :  { %v1260_v62 = vpop.f32.mrf.mxu0 }
  0xef   :  { %v192_v0 = vadd.f32 %v1260_v62, %v979_v47  ;;  %1285 = vmatprep.mubr.bf16.mxu1 %v243_v60  ;;  %v231_v6 = vmax.f32 %v181_v63, 0.0 }
  0xf0   :  { %v183_v2 = vpop.f32.mrf.mxu0  ;;  %1286 = vmatmul.mubr.bf16.vlgmr.msra.gmra.mxu1 %v244_v61 }
  0xf1   :  { %v184_v3 = vadd.f32 %v979_v47, %v183_v2  ;;  %v234_v4 = vmax.f32 %v192_v0, 0.0  ;;  %1334 = vmatpush3.bf16.msra.mxu1 %v1389_v41  ;;  %v1396_v41 = vld [vmem:[%s1679_s7] sm:$0xff]  }
  0xf2   :  { %v1263_v5 = vpop.f32.mrf.mxu0  ;;  %1335 = vmatprep.subr.bf16.mxu1 %v1390_v42 }
  0xf3   :  { %v232_v7 = vmax.f32 %v184_v3, 0.0  ;;  %v246_v11 = vpack.c.bf16 %v234_v4, %v233_v8  ;;  %v205_v15 = vadd.f32 %v1263_v5, %v979_v47 }
  0xf4   :  { %v196_v9 = vpop.f32.mrf.mxu0 }
  0xf5   :  { %v245_v10 = vpack.c.bf16 %v232_v7, %v231_v6  ;;  %v197_v13 = vadd.f32 %v979_v47, %v196_v9  ;;  %v237_v22 = vmax.f32 %v205_v15, 0.0  ;;  %1336 = vmatpush3.bf16.msra.mxu1 %v1390_v42 }
  0xf6   :  { %v1264_v12 = vpop.f32.mrf.mxu0  ;;  %1337 = vmatprep.subr.bf16.mxu1 %v1391_v43 }
  0xf7   :  { %v208_v14 = vadd.f32 %v1264_v12, %v979_v47  ;;  %1289 = vmatprep.mubr.bf16.mxu1 %v245_v10  ;;  %v235_v20 = vmax.f32 %v197_v13, 0.0 }
  0xf8   :  { %v199_v16 = vpop.f32.mrf.mxu0  ;;  %1290 = vmatmul.mubr.bf16.gmra.mxu1 %v246_v11 }
  0xf9   :  { %v200_v17 = vadd.f32 %v979_v47, %v199_v16  ;;  %v238_v18 = vmax.f32 %v208_v14, 0.0  ;;  %1338 = vmatpush3.bf16.msra.mxu1 %v1391_v43  ;;  %v1605_v43 = vld [vmem:[%s1681_s6] ss:$0 sm:$0xff] }
  0xfa   :  { %v1267_v19 = vpop.f32.mrf.mxu0  ;;  %1339 = vmatprep.subr.bf16.mxu1 %v1392_v44 }
  0xfb   :  { %v236_v21 = vmax.f32 %v200_v17, 0.0  ;;  %v248_v25 = vpack.c.bf16 %v238_v18, %v237_v22  ;;  %v221_v29 = vadd.f32 %v1267_v19, %v979_v47 }
  0xfc   :  { %v212_v23 = vpop.f32.mrf.mxu0 }
  0xfd   :  { %v247_v24 = vpack.c.bf16 %v236_v21, %v235_v20  ;;  %v213_v27 = vadd.f32 %v979_v47, %v212_v23  ;;  %v241_v35 = vmax.f32 %v221_v29, 0.0  ;;  %1340 = vmatpush3.bf16.msra.mxu1 %v1392_v44 }
  0xfe   :  { %v1268_v26 = vpop.f32.mrf.mxu0  ;;  %1341 = vmatprep.subr.bf16.mxu1 %v1393_v45 }
  0xff   :  { %v224_v28 = vadd.f32 %v1268_v26, %v979_v47  ;;  %1293 = vmatprep.mubr.bf16.mxu1 %v247_v24  ;;  %v239_v33 = vmax.f32 %v213_v27, 0.0 }
 0x100   :  { %v215_v30 = vpop.f32.mrf.mxu0  ;;  %1294 = vmatmul.mubr.bf16.gmra.mxu1 %v248_v25 }
 0x101   :  { %v216_v31 = vadd.f32 %v979_v47, %v215_v30  ;;  %v242_v32 = vmax.f32 %v224_v28, 0.0  ;;  %1342 = vmatpush3.bf16.msra.mxu1 %v1393_v45 }
 0x102   :  { %1343 = vmatprep.subr.bf16.mxu1 %v1394_v39 }
 0x103   :  { %v240_v34 = vmax.f32 %v216_v31, 0.0  ;;  %v250_v37 = vpack.c.bf16 %v242_v32, %v241_v35 }
 0x105   :  { %v249_v36 = vpack.c.bf16 %v240_v34, %v239_v33  ;;  %1344 = vmatpush3.bf16.msra.mxu1 %v1394_v39 }
 0x106   :  { %1345 = vmatprep.subr.bf16.mxu1 %v1395_v40 }
 0x107   :  { %1297 = vmatprep.mubr.bf16.mxu1 %v249_v36 }
 0x108   :  { %1298 = vmatmul.mubr.bf16.gmra.mxu1 %v250_v37 }
 0x109   :  { %1346 = vmatpush3.bf16.msra.mxu1 %v1395_v40 }
 0x10a   :  { %1347 = vmatprep.subr.bf16.mxu1 %v1396_v41 }
 0x10d   :  { %1348 = vmatpush3.bf16.msra.mxu1 %v1396_v41 }
 0x1b0   :  { %v1287_v46 = vpop.f32.mrf.mxu1 }
 0x1b1   :  { %v365_v52 = vadd.f32 %v1287_v46, %v988_v48 }
 0x1b2   :  { %v356_v47 = vpop.f32.mrf.mxu1 }
 0x1b3   :  { %v357_v50 = vadd.f32 %v988_v48, %v356_v47  ;;  %v421_v59 = vmax.f32 %v365_v52, 0.0 }
 0x1b4   :  { %v1288_v49 = vpop.f32.mrf.mxu1 }
 0x1b5   :  { %v368_v51 = vadd.f32 %v1288_v49, %v988_v48  ;;  %v419_v57 = vmax.f32 %v357_v50, 0.0 }
 0x1b6   :  { %v359_v53 = vpop.f32.mrf.mxu1 }
 0x1b7   :  { %v360_v54 = vadd.f32 %v988_v48, %v359_v53  ;;  %v422_v55 = vmax.f32 %v368_v51, 0.0 }
 0x1b8   :  { %v1291_v56 = vpop.f32.mrf.mxu1 }
 0x1b9   :  { %v420_v58 = vmax.f32 %v360_v54, 0.0  ;;  %v436_v62 = vpack.c.bf16 %v422_v55, %v421_v59  ;;  %v381_v2 = vadd.f32 %v1291_v56, %v988_v48 }
 0x1ba   :  { %v372_v60 = vpop.f32.mrf.mxu1 }
 0x1bb   :  { %v435_v61 = vpack.c.bf16 %v420_v58, %v419_v57  ;;  %v373_v0 = vadd.f32 %v988_v48, %v372_v60  ;;  %v425_v9 = vmax.f32 %v381_v2, 0.0 }
 0x1bc   :  { %v1292_v63 = vpop.f32.mrf.mxu1 }
 0x1bd   :  { %v384_v1 = vadd.f32 %v1292_v63, %v988_v48  ;;  %1317 = vmatprep.mubr.bf16.mxu0 %v435_v61  ;;  %v423_v7 = vmax.f32 %v373_v0, 0.0 }
 0x1be   :  { %v375_v3 = vpop.f32.mrf.mxu1  ;;  %1318 = vmatmul.mubr.bf16.vlgmr.msra.gmra.mxu0 %v436_v62 }
 0x1bf   :  { %v376_v4 = vadd.f32 %v988_v48, %v375_v3  ;;  %v426_v5 = vmax.f32 %v384_v1, 0.0 }
 0x1c0   :  { %v1295_v6 = vpop.f32.mrf.mxu1 }
 0x1c1   :  { %v424_v8 = vmax.f32 %v376_v4, 0.0  ;;  %v438_v12 = vpack.c.bf16 %v426_v5, %v425_v9  ;;  %v397_v16 = vadd.f32 %v1295_v6, %v988_v48 }
 0x1c2   :  { %v388_v10 = vpop.f32.mrf.mxu1 }
 0x1c3   :  { %v437_v11 = vpack.c.bf16 %v424_v8, %v423_v7  ;;  %v389_v14 = vadd.f32 %v988_v48, %v388_v10  ;;  %v429_v23 = vmax.f32 %v397_v16, 0.0 }
 0x1c4   :  { %v1296_v13 = vpop.f32.mrf.mxu1 }
 0x1c5   :  { %v400_v15 = vadd.f32 %v1296_v13, %v988_v48  ;;  %1321 = vmatprep.mubr.bf16.mxu0 %v437_v11  ;;  %v427_v21 = vmax.f32 %v389_v14, 0.0 }
 0x1c6   :  { %v391_v17 = vpop.f32.mrf.mxu1  ;;  %1322 = vmatmul.mubr.bf16.gmra.mxu0 %v438_v12 }
 0x1c7   :  { %v392_v18 = vadd.f32 %v988_v48, %v391_v17  ;;  %v430_v19 = vmax.f32 %v400_v15, 0.0 }
 0x1c8   :  { %v1299_v20 = vpop.f32.mrf.mxu1 }
 0x1c9   :  { %v428_v22 = vmax.f32 %v392_v18, 0.0  ;;  %v440_v26 = vpack.c.bf16 %v430_v19, %v429_v23  ;;  %v413_v30 = vadd.f32 %v1299_v20, %v988_v48 }
 0x1ca   :  { %v404_v24 = vpop.f32.mrf.mxu1 }
 0x1cb   :  { %v439_v25 = vpack.c.bf16 %v428_v22, %v427_v21  ;;  %v405_v28 = vadd.f32 %v988_v48, %v404_v24  ;;  %v433_v36 = vmax.f32 %v413_v30, 0.0 }
 0x1cc   :  { %v1300_v27 = vpop.f32.mrf.mxu1 }
 0x1cd   :  { %v416_v29 = vadd.f32 %v1300_v27, %v988_v48  ;;  %1325 = vmatprep.mubr.bf16.mxu0 %v439_v25  ;;  %v431_v34 = vmax.f32 %v405_v28, 0.0 }
 0x1ce   :  { %v407_v31 = vpop.f32.mrf.mxu1  ;;  %1326 = vmatmul.mubr.bf16.gmra.mxu0 %v440_v26 }
 0x1cf   :  { %v408_v32 = vadd.f32 %v988_v48, %v407_v31  ;;  %v434_v33 = vmax.f32 %v416_v29, 0.0 }
 0x1d1   :  { %v432_v35 = vmax.f32 %v408_v32, 0.0  ;;  %v442_v38 = vpack.c.bf16 %v434_v33, %v433_v36  ;;  %v1006_v36 = vld [vmem:[%s1683_s8] ss:$0 sm:$0xff] }
 0x1d3   :  { %v441_v37 = vpack.c.bf16 %v432_v35, %v431_v34 }
 0x1d5   :  { %1329 = vmatprep.mubr.bf16.mxu0 %v441_v37 }
 0x1d6   :  { %1330 = vmatmul.mubr.bf16.gmra.mxu0 %v442_v38 }
 0x27e   :  { %v1319_v42 = vpop.f32.mrf.mxu0 }
 0x27f   :  { %v557_v45 = vadd.f32 %v1319_v42, %v1605_v43 }
 0x280   :  { %v548_v44 = vpop.f32.mrf.mxu0 }
 0x281   :  { %v549_v47 = vadd.f32 %v1605_v43, %v548_v44  ;;  %v613_v50 = vmax.f32 %v557_v45, 0.0 }
 0x282   :  { %v1320_v46 = vpop.f32.mrf.mxu0 }
 0x283   :  { %v560_v48 = vadd.f32 %v1320_v46, %v1605_v43  ;;  %v611_v54 = vmax.f32 %v549_v47, 0.0 }
 0x284   :  { %v551_v49 = vpop.f32.mrf.mxu0 }
 0x285   :  { %v614_v51 = vmax.f32 %v560_v48, 0.0  ;;  %v552_v52 = vadd.f32 %v1605_v43, %v551_v49 }
 0x286   :  { %v1323_v53 = vpop.f32.mrf.mxu0 }
 0x287   :  { %v628_v55 = vpack.c.bf16 %v614_v51, %v613_v50  ;;  %v612_v56 = vmax.f32 %v552_v52, 0.0  ;;  %v573_v59 = vadd.f32 %v1323_v53, %v1605_v43 }
 0x288   :  { %v564_v57 = vpop.f32.mrf.mxu0 }
 0x289   :  { %1159 = vst [vmem:[%s1682_s9 + $0x8] sm:$0xff] %v628_v55   ;;  %v627_v58 = vpack.c.bf16 %v612_v56, %v611_v54  ;;  %v565_v61 = vadd.f32 %v1605_v43, %v564_v57  ;;  %v617_v0 = vmax.f32 %v573_v59, 0.0 }
 0x28a   :  { %v1324_v60 = vpop.f32.mrf.mxu0 }
 0x28b   :  { %1083 = vst [vmem:[%s1682_s9] sm:$0xff] %v627_v58   ;;  %v576_v62 = vadd.f32 %v1324_v60, %v1605_v43  ;;  %1349 = vmatprep.mubr.bf16.mxu1 %v627_v58  ;;  %v615_v4 = vmax.f32 %v565_v61, 0.0 }
 0x28c   :  { %v567_v63 = vpop.f32.mrf.mxu0  ;;  %1350 = vmatmul.mubr.bf16.vlgmr.msra.gmra.mxu1 %v628_v55 }
 0x28d   :  { %v618_v1 = vmax.f32 %v576_v62, 0.0  ;;  %v568_v2 = vadd.f32 %v1605_v43, %v567_v63 }
 0x28e   :  { %v1327_v3 = vpop.f32.mrf.mxu0 }
 0x28f   :  { %v630_v5 = vpack.c.bf16 %v618_v1, %v617_v0  ;;  %v616_v6 = vmax.f32 %v568_v2, 0.0  ;;  %v589_v9 = vadd.f32 %v1327_v3, %v1605_v43 }
 0x290   :  { %v580_v7 = vpop.f32.mrf.mxu0 }
 0x291   :  { %1161 = vst [vmem:[%s1682_s9 + $0x18] sm:$0xff] %v630_v5   ;;  %v629_v8 = vpack.c.bf16 %v616_v6, %v615_v4  ;;  %v581_v11 = vadd.f32 %v1605_v43, %v580_v7  ;;  %v621_v14 = vmax.f32 %v589_v9, 0.0 }
 0x292   :  { %v1328_v10 = vpop.f32.mrf.mxu0 }
 0x293   :  { %1160 = vst [vmem:[%s1682_s9 + $0x10] sm:$0xff] %v629_v8   ;;  %v592_v12 = vadd.f32 %v1328_v10, %v1605_v43  ;;  %1353 = vmatprep.mubr.bf16.mxu1 %v629_v8  ;;  %v619_v18 = vmax.f32 %v581_v11, 0.0 }
 0x294   :  { %v583_v13 = vpop.f32.mrf.mxu0  ;;  %1354 = vmatmul.mubr.bf16.gmra.mxu1 %v630_v5 }
 0x295   :  { %v622_v15 = vmax.f32 %v592_v12, 0.0  ;;  %v584_v16 = vadd.f32 %v1605_v43, %v583_v13 }
 0x296   :  { %v1331_v17 = vpop.f32.mrf.mxu0 }
 0x297   :  { %v632_v19 = vpack.c.bf16 %v622_v15, %v621_v14  ;;  %v620_v20 = vmax.f32 %v584_v16, 0.0  ;;  %v605_v23 = vadd.f32 %v1331_v17, %v1605_v43 }
 0x298   :  { %v596_v21 = vpop.f32.mrf.mxu0 }
 0x299   :  { %1163 = vst [vmem:[%s1682_s9 + $0x28] sm:$0xff] %v632_v19   ;;  %v631_v22 = vpack.c.bf16 %v620_v20, %v619_v18  ;;  %v597_v25 = vadd.f32 %v1605_v43, %v596_v21  ;;  %v625_v28 = vmax.f32 %v605_v23, 0.0 }
 0x29a   :  { %v1332_v24 = vpop.f32.mrf.mxu0 }
 0x29b   :  { %1162 = vst [vmem:[%s1682_s9 + $0x20] sm:$0xff] %v631_v22   ;;  %v608_v26 = vadd.f32 %v1332_v24, %v1605_v43  ;;  %1357 = vmatprep.mubr.bf16.mxu1 %v631_v22  ;;  %v623_v31 = vmax.f32 %v597_v25, 0.0 }
 0x29c   :  { %v599_v27 = vpop.f32.mrf.mxu0  ;;  %1358 = vmatmul.mubr.bf16.gmra.mxu1 %v632_v19 }
 0x29d   :  { %v626_v29 = vmax.f32 %v608_v26, 0.0  ;;  %v600_v30 = vadd.f32 %v1605_v43, %v599_v27 }
 0x29f   :  { %v634_v32 = vpack.c.bf16 %v626_v29, %v625_v28  ;;  %v624_v33 = vmax.f32 %v600_v30, 0.0 }
 0x2a1   :  { %1165 = vst [vmem:[%s1682_s9 + $0x38] sm:$0xff] %v634_v32   ;;  %v633_v34 = vpack.c.bf16 %v624_v33, %v623_v31 }
 0x2a3   :  { %1164 = vst [vmem:[%s1682_s9 + $0x30] sm:$0xff] %v633_v34   ;;  %1361 = vmatprep.mubr.bf16.mxu1 %v633_v34 }
 0x2a4   :  { %1362 = vmatmul.mubr.bf16.gmra.mxu1 %v634_v32 }
 0x34c   :  { %v1351_v35 = vpop.f32.mrf.mxu1 }
 0x34d   :  { %v749_v38 = vadd.f32 %v1351_v35, %v1006_v36 }
 0x34e   :  { %v740_v37 = vpop.f32.mrf.mxu1 }
 0x34f   :  { %v741_v40 = vadd.f32 %v1006_v36, %v740_v37  ;;  %v805_v43 = vmax.f32 %v749_v38, 0.0 }
 0x350   :  { %v1352_v39 = vpop.f32.mrf.mxu1 }
 0x351   :  { %v752_v41 = vadd.f32 %v1352_v39, %v1006_v36  ;;  %v803_v47 = vmax.f32 %v741_v40, 0.0 }
 0x352   :  { %v743_v42 = vpop.f32.mrf.mxu1 }
 0x353   :  { %v806_v44 = vmax.f32 %v752_v41, 0.0  ;;  %v744_v45 = vadd.f32 %v1006_v36, %v743_v42 }
 0x354   :  { %v1355_v46 = vpop.f32.mrf.mxu1 }
 0x355   :  { %v1127_v48 = vpack.c.bf16 %v806_v44, %v805_v43  ;;  %v804_v49 = vmax.f32 %v744_v45, 0.0  ;;  %v765_v52 = vadd.f32 %v1355_v46, %v1006_v36 }
 0x356   :  { %v756_v50 = vpop.f32.mrf.mxu1 }
 0x357   :  { %1166 = vst [vmem:[%s1684_s10 + $0x8] sm:$0xff] %v1127_v48   ;;  %v1122_v51 = vpack.c.bf16 %v804_v49, %v803_v47  ;;  %v757_v54 = vadd.f32 %v1006_v36, %v756_v50  ;;  %v809_v57 = vmax.f32 %v765_v52, 0.0 }
 0x358   :  { %v1356_v53 = vpop.f32.mrf.mxu1 }
 0x359   :  { %1123 = vst [vmem:[%s1684_s10] sm:$0xff] %v1122_v51   ;;  %v768_v55 = vadd.f32 %v1356_v53, %v1006_v36  ;;  %v807_v61 = vmax.f32 %v757_v54, 0.0 }
 0x35a   :  { %v759_v56 = vpop.f32.mrf.mxu1 }
 0x35b   :  { %v810_v58 = vmax.f32 %v768_v55, 0.0  ;;  %v760_v59 = vadd.f32 %v1006_v36, %v759_v56 }
 0x35c   :  { %v1359_v60 = vpop.f32.mrf.mxu1 }
 0x35d   :  { %v1137_v62 = vpack.c.bf16 %v810_v58, %v809_v57  ;;  %v808_v63 = vmax.f32 %v760_v59, 0.0  ;;  %v781_v2 = vadd.f32 %v1359_v60, %v1006_v36 }
 0x35e   :  { %v772_v0 = vpop.f32.mrf.mxu1 }
 0x35f   :  { %1168 = vst [vmem:[%s1684_s10 + $0x18] sm:$0xff] %v1137_v62   ;;  %v1132_v1 = vpack.c.bf16 %v808_v63, %v807_v61  ;;  %v773_v4 = vadd.f32 %v1006_v36, %v772_v0  ;;  %v813_v7 = vmax.f32 %v781_v2, 0.0 }
 0x360   :  { %v1360_v3 = vpop.f32.mrf.mxu1 }
 0x361   :  { %1167 = vst [vmem:[%s1684_s10 + $0x10] sm:$0xff] %v1132_v1   ;;  %v784_v5 = vadd.f32 %v1360_v3, %v1006_v36  ;;  %v811_v11 = vmax.f32 %v773_v4, 0.0 }
 0x362   :  { %v775_v6 = vpop.f32.mrf.mxu1 }
 0x363   :  { %v814_v8 = vmax.f32 %v784_v5, 0.0  ;;  %v776_v9 = vadd.f32 %v1006_v36, %v775_v6 }
 0x364   :  { %v1363_v10 = vpop.f32.mrf.mxu1 }
 0x365   :  { %v1147_v12 = vpack.c.bf16 %v814_v8, %v813_v7  ;;  %v812_v13 = vmax.f32 %v776_v9, 0.0  ;;  %v797_v16 = vadd.f32 %v1363_v10, %v1006_v36 }
 0x366   :  { %v788_v14 = vpop.f32.mrf.mxu1 }
 0x367   :  { %1170 = vst [vmem:[%s1684_s10 + $0x28] sm:$0xff] %v1147_v12   ;;  %v1142_v15 = vpack.c.bf16 %v812_v13, %v811_v11  ;;  %v789_v18 = vadd.f32 %v1006_v36, %v788_v14  ;;  %v817_v21 = vmax.f32 %v797_v16, 0.0 }
 0x368   :  { %v1364_v17 = vpop.f32.mrf.mxu1 }
 0x369   :  { %1169 = vst [vmem:[%s1684_s10 + $0x20] sm:$0xff] %v1142_v15   ;;  %v800_v19 = vadd.f32 %v1364_v17, %v1006_v36  ;;  %v815_v24 = vmax.f32 %v789_v18, 0.0 }
 0x36a   :  { %v791_v20 = vpop.f32.mrf.mxu1 }
 0x36b   :  { %v818_v22 = vmax.f32 %v800_v19, 0.0  ;;  %v792_v23 = vadd.f32 %v1006_v36, %v791_v20 }
 0x36d   :  { %v1157_v25 = vpack.c.bf16 %v818_v22, %v817_v21  ;;  %v816_v26 = vmax.f32 %v792_v23, 0.0 }
 0x36f   :  { %1172 = vst [vmem:[%s1684_s10 + $0x38] sm:$0xff] %v1157_v25   ;;  %v1152_v27 = vpack.c.bf16 %v816_v26, %v815_v24 }
 0x371   :  { %1171 = vst [vmem:[%s1684_s10 + $0x30] sm:$0xff] %v1152_v27  }

</bundles_post_ra>
